<compile_context>
chip_gen: v7x
topology: tpu7x:2x2x1
jax: 0.10.0
libtpu: 0.0.40
codegen_flags: <defaults>
</compile_context>

<pallas_src>
import functools

import jax
import jax.numpy as jnp
from jax.experimental import pallas as pl
from jax.experimental.pallas import tpu as pltpu

MAX_PIXEL_TILE = 2048   # lanes per block along the flattened pixel axis


def _pick_tile(n, batch, max_tile=MAX_PIXEL_TILE, align=128):
    """Largest legal pixel tile (a 128-multiple divisor of n, or n itself)."""
    if batch < 2 and n % (2 * align) == 0:
        # keep >=2 grid steps so both v7x TensorCores get work
        max_tile = min(max_tile, n // 2)
    if n <= max_tile:
        return n
    t = (max_tile // align) * align
    while t > 0:
        if n % t == 0:
            return t
        t -= align
    return n   # TODO(synk): ragged huge pixel axes would need in-kernel masking


def _cp(n_parallel_axes):
    return pltpu.CompilerParams(
        dimension_semantics=("parallel",) * n_parallel_axes,
        vmem_limit_bytes=32 * 1024 * 1024,   # safe on v5e/v6e/v7x
    )


# ----------------------------------------------------------------------------
# Pallas kernels (channels-major blocks: (..., channels, pixel_tile))
# ----------------------------------------------------------------------------
def _ln_proj_kernel(x_ref, w_ref, b_ref, o_ref, *, eps):
    # LayerNorm over channels fused with proj_1 (gamma/beta already folded
    # into w_ref/b_ref at prepare_params time).
    x = x_ref[0].astype(jnp.float32)                            # (C, TP)
    u = jnp.mean(x, axis=0, keepdims=True)
    s = jnp.mean((x - u) ** 2, axis=0, keepdims=True)
    y = (x - u) * jax.lax.rsqrt(s + eps)
    acc = jnp.dot(w_ref[...], y, preferred_element_type=jnp.float32)
    o_ref[0] = (acc + b_ref[...]).astype(o_ref.dtype)


def _offset_conv_kernel(x_ref, w_ref, b_ref, o_ref, col_ref, *, H, W, KS):
    # p_conv: 3x3, stride 1, pad 1 -- computed on the channels-major (C, H*W)
    # view.  The 9 shifted & edge-masked copies of the input are packed along
    # the contraction axis into a VMEM scratch (tap-major, rows n*C + c), then
    # a single (2N, 9C) @ (9C, H*W) MXU matmul with lane-dense output stores.
    HW = H * W
    C = x_ref.shape[1]
    PAD = ((W + 1 + 127) // 128) * 128          # lane-aligned flat halo, >= W+1
    x = x_ref[0].astype(jnp.float32)                            # (C, HW)
    zeros = jnp.zeros((C, PAD), jnp.float32)
    xp = jnp.concatenate([zeros, x, zeros], axis=1)             # (C, HW + 2*PAD)
    colj = jax.lax.broadcasted_iota(jnp.int32, (1, HW), 1) % W  # column index
    half = (KS - 1) // 2
    for kh in range(KS):
        for kw in range(KS):
            dr, dc = kh - half, kw - half
            n = kh * KS + kw
            start = PAD + dr * W + dc
            win = xp[:, start:start + HW]                       # flat shift
            ok = (colj + dc >= 0) & (colj + dc < W)             # column halo mask
            col_ref[n * C:(n + 1) * C, :] = jnp.where(ok, win, 0.0)
    acc = jnp.dot(w_ref[...], col_ref[...], preferred_element_type=jnp.float32)
    o_ref[0] = (acc + b_ref[...]).astype(o_ref.dtype)


def _conv_tail_kernel(x_ref, w_ref, o_ref):
    # ks-strided conv of DeformConv2d == (Oc, C*N) @ (C*N, TP) matmul (no bias).
    o_ref[0] = jnp.dot(w_ref[...], x_ref[0].astype(jnp.float32),
                       preferred_element_type=jnp.float32).astype(o_ref.dtype)


def _gate_proj2_res_kernel(a_ref, w1_ref, b1_ref, u_ref, w2_ref, b2_ref,
                           r_ref, o_ref):
    # Fused: conv1 (LKA) -> spatial gate -> proj_2 (scale folded in) -> residual.
    a = jnp.dot(w1_ref[...], a_ref[0].astype(jnp.float32),
                preferred_element_type=jnp.float32) + b1_ref[...]
    g = u_ref[0].astype(jnp.float32) * a
    out = jnp.dot(w2_ref[...], g, preferred_element_type=jnp.float32) + b2_ref[...]
    o_ref[0] = (out + r_ref[0].astype(jnp.float32)).astype(o_ref.dtype)


# ----------------------------------------------------------------------------
# pallas_call wrappers
# ----------------------------------------------------------------------------
def ln_proj1(x_cm, w, b, tp, eps=1e-6, out_dtype=jnp.bfloat16):
    B, C, HW = x_cm.shape
    O = w.shape[0]
    return pl.pallas_call(
        functools.partial(_ln_proj_kernel, eps=eps),
        out_shape=jax.ShapeDtypeStruct((B, O, HW), out_dtype),
        grid=(B, HW // tp),
        in_specs=[
            pl.BlockSpec((1, C, tp), lambda b_, t: (b_, 0, t)),
            pl.BlockSpec((O, C), lambda b_, t: (0, 0)),
            pl.BlockSpec((O, 1), lambda b_, t: (0, 0)),
        ],
        out_specs=pl.BlockSpec((1, O, tp), lambda b_, t: (b_, 0, t)),
        compiler_params=_cp(2),
    )(x_cm, w, b)


def offset_conv(x_cm, p_w, p_b, H, W, ks=3):
    # Whole-image per batch step (fits VMEM at SR patch sizes).
    # TODO(synk): for very large H*W tile row bands with an explicit halo.
    B, C, HW = x_cm.shape
    O = p_w.shape[0]                       # 2 * ks * ks
    return pl.pallas_call(
        functools.partial(_offset_conv_kernel, H=H, W=W, KS=ks),
        out_shape=jax.ShapeDtypeStruct((B, O, HW), jnp.float32),
        grid=(B,),
        in_specs=[
            pl.BlockSpec((1, C, HW), lambda b_: (b_, 0, 0)),
            pl.BlockSpec((O, ks * ks * C), lambda b_: (0, 0)),
            pl.BlockSpec((O, 1), lambda b_: (0, 0)),
        ],
        out_specs=pl.BlockSpec((1, O, HW), lambda b_: (b_, 0, 0)),
        scratch_shapes=[pltpu.VMEM((ks * ks * C, HW), jnp.float32)],
        compiler_params=_cp(1),
    )(x_cm, p_w, p_b)


def gate_proj2_res(attn_cm, w1, b1, u_cm, w2, b2, res_cm, tp):
    B, C, HW = attn_cm.shape
    return pl.pallas_call(
        _gate_proj2_res_kernel,
        out_shape=jax.ShapeDtypeStruct((B, C, HW), res_cm.dtype),
        grid=(B, HW // tp),
        in_specs=[
            pl.BlockSpec((1, C, tp), lambda b_, t: (b_, 0, t)),
            pl.BlockSpec((C, C), lambda b_, t: (0, 0)),
            pl.BlockSpec((C, 1), lambda b_, t: (0, 0)),
            pl.BlockSpec((1, C, tp), lambda b_, t: (b_, 0, t)),
            pl.BlockSpec((C, C), lambda b_, t: (0, 0)),
            pl.BlockSpec((C, 1), lambda b_, t: (0, 0)),
            pl.BlockSpec((1, C, tp), lambda b_, t: (b_, 0, t)),
        ],
        out_specs=pl.BlockSpec((1, C, tp), lambda b_, t: (b_, 0, t)),
        compiler_params=_cp(2),
    )(attn_cm, w1, b1, u_cm, w2, b2, res_cm)


# ----------------------------------------------------------------------------
# DeformConv2d forward (matches the PyTorch reference semantics)
# ----------------------------------------------------------------------------
def deform_conv2d(x_cm, dp, H, W, padding, tp, out_dtype=jnp.bfloat16, ks=3):
    B, C, HW = x_cm.shape
    N = ks * ks

    # offsets from p_conv on the UNPADDED input (Pallas, f32)
    off = offset_conv(x_cm, dp["p_w"], dp["p_b"], H, W, ks=ks)          # (B, 2N, HW)

    Hp, Wp = H + 2 * padding, W + 2 * padding

    # sampling positions p = p_0 + p_n + offset  (rows = first N, cols = last N)
    base_r = jnp.repeat(jnp.arange(1, H + 1, dtype=jnp.float32), W).reshape(1, 1, HW)
    base_c = jnp.tile(jnp.arange(1, W + 1, dtype=jnp.float32), H).reshape(1, 1, HW)
    rng = jnp.arange(-(ks - 1) // 2, (ks - 1) // 2 + 1, dtype=jnp.float32)
    pn_r = jnp.repeat(rng, ks).reshape(1, N, 1)
    pn_c = jnp.tile(rng, ks).reshape(1, N, 1)
    p_r = base_r + pn_r + off[:, :N, :]
    p_c = base_c + pn_c + off[:, N:, :]

    fl_r, fl_c = jnp.floor(p_r), jnp.floor(p_c)
    lt_r = jnp.clip(fl_r, 0, Hp - 1)
    lt_c = jnp.clip(fl_c, 0, Wp - 1)
    rb_r = jnp.clip(fl_r + 1.0, 0, Hp - 1)
    rb_c = jnp.clip(fl_c + 1.0, 0, Wp - 1)
    pr = jnp.clip(p_r, 0, Hp - 1)
    pc = jnp.clip(p_c, 0, Wp - 1)

    g_lt = (1.0 + (lt_r - pr)) * (1.0 + (lt_c - pc))
    g_rb = (1.0 - (rb_r - pr)) * (1.0 - (rb_c - pc))
    g_lb = (1.0 + (lt_r - pr)) * (1.0 - (rb_c - pc))
    g_rt = (1.0 - (rb_r - pr)) * (1.0 + (lt_c - pc))
    gates = jnp.stack([g_lt, g_rb, g_lb, g_rt], axis=1)                 # (B,4,N,HW)

    lt_ri, lt_ci = lt_r.astype(jnp.int32), lt_c.astype(jnp.int32)
    rb_ri, rb_ci = rb_r.astype(jnp.int32), rb_c.astype(jnp.int32)
    idx = jnp.stack([lt_ri * Wp + lt_ci, rb_ri * Wp + rb_ci,
                     lt_ri * Wp + rb_ci, rb_ri * Wp + lt_ci], axis=1)   # (B,4,N,HW)

    x_pad = jnp.pad(x_cm.reshape(B, C, H, W),
                    ((0, 0), (0, 0), (padding, padding), (padding, padding)))
    x_pad = x_pad.reshape(B, C, Hp * Wp)

    # TODO(synk): the data-dependent bilinear gather has no rectangular
    # BlockSpec equivalent, so it stays in JAX -- but the four corners are
    # pre-combined here so only the (B, C*N, HW) x_off tensor (not 4x gathered
    # corners + gates) ever reaches HBM / the Pallas tail kernel.
    def combine(xb, ib, gb):            # (C, HpWp), (4, N, HW), (4, N, HW)
        xq = jnp.take(xb, ib.reshape(-1), axis=1).astype(jnp.float32)
        xq = xq.reshape(C, 4, N, HW)
        return jnp.sum(xq * gb[None], axis=1).reshape(C * N, HW)

    x_off = jax.vmap(combine)(x_pad, idx, gates).astype(jnp.bfloat16)   # (B, C*N, HW)

    Oc = dp["w"].shape[0]
    return pl.pallas_call(
        _conv_tail_kernel,
        out_shape=jax.ShapeDtypeStruct((B, Oc, HW), out_dtype),
        grid=(B, HW // tp),
        in_specs=[
            pl.BlockSpec((1, C * N, tp), lambda b_, t: (b_, 0, t)),
            pl.BlockSpec((Oc, C * N), lambda b_, t: (0, 0)),
        ],
        out_specs=pl.BlockSpec((1, Oc, tp), lambda b_, t: (b_, 0, t)),
        compiler_params=_cp(2),
    )(x_off, dp["w"])


# ----------------------------------------------------------------------------
# Attention forward (NCHW in / NCHW out, channels-major inside)
# ----------------------------------------------------------------------------
def attention_forward(x, params):
    B, C, H, W = x.shape
    HW = H * W
    tp = _pick_tile(HW, B)
    x_cm = x.reshape(B, C, HW)                      # free view, no transpose

    # LayerNorm (folded affine) + proj_1; bf16 activation to HBM.
    x1 = ln_proj1(x_cm, params["proj1_w"], params["proj1_b"], tp)
    lka = params["lka"]
    attn = deform_conv2d(x1, lka["conv0"], H, W, padding=2, tp=tp)
    attn = deform_conv2d(attn, lka["conv_spatial"], H, W, padding=9, tp=tp)
    # conv1 + spatial gate + proj_2 (+ folded scale) + residual, one kernel.
    out = gate_proj2_res(attn, lka["conv1_w"], lka["conv1_b"], x1,
                         params["proj2_w"], params["proj2_b"], x_cm, tp)
    return out.reshape(B, C, H, W)


# ----------------------------------------------------------------------------
# Parameters: init in PyTorch layout, then a one-time re-layout for the kernels
# ----------------------------------------------------------------------------
def init_params(key, n_feats, ks=3):
    N = ks * ks
    keys = jax.random.split(key, 16)

    def nrm(k, shape, scale=0.1):
        return (scale * jax.random.normal(k, shape)).astype(jnp.float32)

    def deform_params(k1, k2, k3):
        return dict(
            w=nrm(k1, (n_feats, n_feats, ks, ks)),          # self.conv (no bias)
            p_w=nrm(k2, (2 * N, n_feats, 3, 3), 0.02),      # self.p_conv weight
            p_b=nrm(k3, (2 * N,), 0.5),                     # self.p_conv bias
        )

    return dict(
        norm_w=jnp.ones((n_feats,), jnp.float32),
        norm_b=jnp.zeros((n_feats,), jnp.float32),
        scale=nrm(keys[0], (1, n_feats, 1, 1)),
        proj1_w=nrm(keys[1], (n_feats, n_feats, 1, 1)),
        proj1_b=nrm(keys[2], (n_feats,)),
        proj2_w=nrm(keys[3], (n_feats, n_feats, 1, 1)),
        proj2_b=nrm(keys[4], (n_feats,)),
        lka=dict(
            conv0=deform_params(keys[5], keys[6], keys[7]),
            conv_spatial=deform_params(keys[8], keys[9], keys[10]),
            conv1_w=nrm(keys[11], (n_feats, n_feats, 1, 1)),
            conv1_b=nrm(keys[12], (n_feats,)),
        ),
    )


def prepare_params(p):
    # One-time re-layout + constant folding of PyTorch-shaped weights into
    # kernel layouts (outside the traced forward, no per-call transposes).
    C = p["norm_w"].shape[0]

    def col(v):
        return v.reshape(-1, 1).astype(jnp.float32)

    # Fold LayerNorm gamma/beta into proj_1: W1@(g*y + b) + b1 = (W1*g)@y + (W1@b + b1)
    gamma = p["norm_w"].reshape(1, C)
    beta = p["norm_b"].reshape(C)
    w1 = p["proj1_w"].reshape(C, C)
    proj1_w = (w1 * gamma).astype(jnp.float32)
    proj1_b = (w1 @ beta + p["proj1_b"].reshape(C)).reshape(C, 1).astype(jnp.float32)

    # Fold `scale` into proj_2: (W2@g + b2)*s + res = (s*W2)@g + s*b2 + res
    scale = p["scale"].reshape(C, 1)
    w2 = p["proj2_w"].reshape(C, C)
    proj2_w = (scale * w2).astype(jnp.float32)
    proj2_b = (scale * p["proj2_b"].reshape(C, 1)).astype(jnp.float32)

    def deform(d):
        oc, n2 = d["w"].shape[0], d["p_w"].shape[0]
        return dict(
            w=d["w"].reshape(oc, -1).astype(jnp.float32),      # (Oc, C*9), index c*9+n
            p_w=d["p_w"].transpose(0, 2, 3, 1).reshape(n2, -1).astype(jnp.float32),
                                                               # (2N, 9*C), tap-major n*C+c
            p_b=col(d["p_b"]),                                 # (2N, 1)
        )

    return dict(
        proj1_w=proj1_w, proj1_b=proj1_b,
        proj2_w=proj2_w, proj2_b=proj2_b,
        lka=dict(
            conv0=deform(p["lka"]["conv0"]),
            conv_spatial=deform(p["lka"]["conv_spatial"]),
            conv1_w=p["lka"]["conv1_w"].reshape(C, C).astype(jnp.float32),
            conv1_b=col(p["lka"]["conv1_b"]),
        ),
    )


if __name__ == "__main__":
    key = jax.random.PRNGKey(0)
    kx, kp = jax.random.split(key)
    B, C, H, W = 2, 4, 16, 16
    x = jax.random.normal(kx, (B, C, H, W), jnp.float32)
    params = prepare_params(init_params(kp, C))

    fwd = jax.jit(attention_forward)
    y = fwd(x, params)
    jax.block_until_ready(y)
    assert y.shape == (B, C, H, W) and y.dtype == jnp.float32
    assert bool(jnp.all(jnp.isfinite(y)))
    print("KERNEL_OK")
</pallas_src>

<mosaic_0001>
module attributes {stable_mosaic.version = 11 : i64} {
  func.func @_ln_proj_kernel(%arg0: i32, %arg1: i32, %arg2: memref<1x4x256xf32, #tpu.memory_space<vmem>>, %arg3: memref<4x4xf32, #tpu.memory_space<vmem>>, %arg4: memref<4x1xf32, #tpu.memory_space<vmem>>, %arg5: memref<1x4x256xbf16, #tpu.memory_space<vmem>>) attributes {dimension_semantics = [#tpu.dimension_semantics<parallel>, #tpu.dimension_semantics<parallel>], iteration_bounds = array<i64: 2, 1>, scalar_prefetch = 0 : i64, scratch_operands = 0 : i64, tpu.core_type = #tpu.core_type<tc>, window_params = [{transform_indices = @transform_0, window_bounds = array<i64: 1, 4, 256>}, {pipeline_mode = #tpu.pipeline_mode<synchronous>, transform_indices = @transform_1, window_bounds = array<i64: 4, 4>}, {pipeline_mode = #tpu.pipeline_mode<synchronous>, transform_indices = @transform_2, window_bounds = array<i64: 4, 1>}, {transform_indices = @transform_3, window_bounds = array<i64: 1, 4, 256>}]} {
    %c0 = arith.constant 0 : index
    %c0_0 = arith.constant 0 : index
    %c0_1 = arith.constant 0 : index
    %0 = vector.load %arg2[%c0, %c0_0, %c0_1] : memref<1x4x256xf32, #tpu.memory_space<vmem>>, vector<1x4x256xf32>
    %1 = vector.shape_cast %0 : vector<1x4x256xf32> to vector<4x256xf32>
    %cst = arith.constant dense<0.000000e+00> : vector<256xf32>
    %2 = vector.multi_reduction <add>, %1, %cst [0] : vector<4x256xf32> to vector<256xf32>
    %3 = vector.shape_cast %2 : vector<256xf32> to vector<1x256xf32>
    %cst_2 = arith.constant 4.000000e+00 : f32
    %4 = vector.broadcast %cst_2 : f32 to vector<1x256xf32>
    %5 = arith.divf %3, %4 : vector<1x256xf32>
    %6 = vector.broadcast %5 : vector<1x256xf32> to vector<4x256xf32>
    %7 = arith.subf %1, %6 : vector<4x256xf32>
    %8 = arith.mulf %7, %7 : vector<4x256xf32>
    %cst_3 = arith.constant dense<0.000000e+00> : vector<256xf32>
    %9 = vector.multi_reduction <add>, %8, %cst_3 [0] : vector<4x256xf32> to vector<256xf32>
    %10 = vector.shape_cast %9 : vector<256xf32> to vector<1x256xf32>
    %cst_4 = arith.constant 4.000000e+00 : f32
    %11 = vector.broadcast %cst_4 : f32 to vector<1x256xf32>
    %12 = arith.divf %10, %11 : vector<1x256xf32>
    %13 = vector.broadcast %5 : vector<1x256xf32> to vector<4x256xf32>
    %14 = arith.subf %1, %13 : vector<4x256xf32>
    %cst_5 = arith.constant 9.99999997E-7 : f32
    %15 = vector.broadcast %cst_5 : f32 to vector<1x256xf32>
    %16 = arith.addf %12, %15 : vector<1x256xf32>
    %17 = math.rsqrt %16 : vector<1x256xf32>
    %18 = vector.broadcast %17 : vector<1x256xf32> to vector<4x256xf32>
    %19 = arith.mulf %14, %18 : vector<4x256xf32>
    %c0_6 = arith.constant 0 : index
    %c0_7 = arith.constant 0 : index
    %20 = vector.load %arg3[%c0_6, %c0_7] : memref<4x4xf32, #tpu.memory_space<vmem>>, vector<4x4xf32>
    %cst_8 = arith.constant dense<0.000000e+00> : vector<4x256xf32>
    %21 = tpu.matmul %20, %19, %cst_8 {dimension_numbers = #tpu.dot_dimension_numbers<[1], [0], [0], [1], [0, 0, 1, 1], [], []>} : vector<4x4xf32>, vector<4x256xf32>, vector<4x256xf32> -> vector<4x256xf32>
    %c0_9 = arith.constant 0 : index
    %c0_10 = arith.constant 0 : index
    %22 = vector.load %arg4[%c0_9, %c0_10] : memref<4x1xf32, #tpu.memory_space<vmem>>, vector<4x1xf32>
    %23 = vector.broadcast %22 : vector<4x1xf32> to vector<4x256xf32>
    %24 = arith.addf %21, %23 : vector<4x256xf32>
    %25 = arith.truncf %24 : vector<4x256xf32> to vector<4x256xbf16>
    %c0_11 = arith.constant 0 : index
    %c0_12 = arith.constant 0 : index
    %c0_13 = arith.constant 0 : index
    %26 = vector.load %arg5[%c0_11, %c0_12, %c0_13] : memref<1x4x256xbf16, #tpu.memory_space<vmem>>, vector<1x4x256xbf16>
    %27 = vector.shape_cast %26 : vector<1x4x256xbf16> to vector<4x256xbf16>
    %28 = vector.shape_cast %25 : vector<4x256xbf16> to vector<1x4x256xbf16>
    tpu.vector_store %arg5[%c0_11, %c0_12, %c0_13], %28 {strides = array<i32>} : memref<1x4x256xbf16, #tpu.memory_space<vmem>>, vector<1x4x256xbf16>,
    return
  }
  func.func @transform_0(%arg0: i32, %arg1: i32) -> (i32, i32, i32) {
    %c0_i32 = arith.constant 0 : i32
    %c0_i32_0 = arith.constant 0 : i32
    return %arg0, %c0_i32, %arg1 : i32, i32, i32
  }
  func.func @transform_1(%arg0: i32, %arg1: i32) -> (i32, i32) {
    %c0_i32 = arith.constant 0 : i32
    %c0_i32_0 = arith.constant 0 : i32
    %c0_i32_1 = arith.constant 0 : i32
    return %c0_i32, %c0_i32_0 : i32, i32
  }
  func.func @transform_2(%arg0: i32, %arg1: i32) -> (i32, i32) {
    %c0_i32 = arith.constant 0 : i32
    %c0_i32_0 = arith.constant 0 : i32
    %c0_i32_1 = arith.constant 0 : i32
    return %c0_i32, %c0_i32_0 : i32, i32
  }
  func.func @transform_3(%arg0: i32, %arg1: i32) -> (i32, i32, i32) {
    %c0_i32 = arith.constant 0 : i32
    %c0_i32_0 = arith.constant 0 : i32
    return %arg0, %c0_i32, %arg1 : i32, i32, i32
  }
}

module attributes {stable_mosaic.version = 11 : i64} {
  func.func @_offset_conv_kernel(%arg0: i32, %arg1: memref<1x4x256xbf16, #tpu.memory_space<vmem>>, %arg2: memref<18x36xf32, #tpu.memory_space<vmem>>, %arg3: memref<18x1xf32, #tpu.memory_space<vmem>>, %arg4: memref<1x18x256xf32, #tpu.memory_space<vmem>>, %arg5: memref<36x256xf32, #tpu.memory_space<vmem>>) attributes {dimension_semantics = [#tpu.dimension_semantics<parallel>], iteration_bounds = array<i64: 2>, scalar_prefetch = 0 : i64, scratch_operands = 1 : i64, tpu.core_type = #tpu.core_type<tc>, window_params = [{transform_indices = @transform_0, window_bounds = array<i64: 1, 4, 256>}, {pipeline_mode = #tpu.pipeline_mode<synchronous>, transform_indices = @transform_1, window_bounds = array<i64: 18, 36>}, {pipeline_mode = #tpu.pipeline_mode<synchronous>, transform_indices = @transform_2, window_bounds = array<i64: 18, 1>}, {transform_indices = @transform_3, window_bounds = array<i64: 1, 18, 256>}]} {
    %c0 = arith.constant 0 : index
    %c0_0 = arith.constant 0 : index
    %c0_1 = arith.constant 0 : index
    %0 = vector.load %arg1[%c0, %c0_0, %c0_1] : memref<1x4x256xbf16, #tpu.memory_space<vmem>>, vector<1x4x256xbf16>
    %1 = vector.shape_cast %0 : vector<1x4x256xbf16> to vector<4x256xbf16>
    %2 = arith.extf %1 : vector<4x256xbf16> to vector<4x256xf32>
    %cst = arith.constant 0.000000e+00 : f32
    %3 = vector.broadcast %cst : f32 to vector<4x128xf32>
    %4 = tpu.concatenate %3, %2, %3 in 1 : vector<4x128xf32>, vector<4x256xf32>, vector<4x128xf32> -> vector<4x512xf32>
    %5 = tpu.iota {dimensions = array<i32: 1>} : vector<1x256xi32>
    %c16_i32 = arith.constant 16 : i32
    %c0_i32 = arith.constant 0 : i32
    %6 = arith.cmpi eq, %c16_i32, %c0_i32 : i32
    %c1_i32 = arith.constant 1 : i32
    %7 = arith.select %6, %c1_i32, %c16_i32 : i32
    %8 = vector.broadcast %7 : i32 to vector<1x256xi32>
    %9 = arith.remsi %5, %8 : vector<1x256xi32>
    %c0_i32_2 = arith.constant 0 : i32
    %10 = vector.broadcast %c0_i32_2 : i32 to vector<1x256xi32>
    %11 = arith.cmpi ne, %9, %10 : vector<1x256xi32>
    %c0_i32_3 = arith.constant 0 : i32
    %12 = vector.broadcast %c0_i32_3 : i32 to vector<1x256xi32>
    %13 = arith.cmpi slt, %9, %12 : vector<1x256xi32>
    %c0_i32_4 = arith.constant 0 : i32
    %14 = arith.cmpi slt, %7, %c0_i32_4 : i32
    %15 = vector.broadcast %14 : i1 to vector<1x256xi1>
    %16 = vector.broadcast %15 : vector<1x256xi1> to vector<1x256xi1>
    %17 = arith.xori %13, %16 : vector<1x256xi1>
    %18 = arith.andi %17, %11 : vector<1x256xi1>
    %19 = vector.broadcast %7 : i32 to vector<1x256xi32>
    %20 = arith.addi %9, %19 : vector<1x256xi32>
    %21 = arith.select %18, %20, %9 : vector<1x256xi1>, vector<1x256xi32>
    %22 = vector.extract_strided_slice %4 {offsets = [0, 111], sizes = [4, 256], strides = [1, 1]} : vector<4x512xf32> to vector<4x256xf32>
    %c-1_i32 = arith.constant -1 : i32
    %23 = vector.broadcast %c-1_i32 : i32 to vector<1x256xi32>
    %24 = arith.addi %21, %23 : vector<1x256xi32>
    %c0_i32_5 = arith.constant 0 : i32
    %25 = vector.broadcast %c0_i32_5 : i32 to vector<1x256xi32>
    %26 = arith.cmpi sge, %24, %25 : vector<1x256xi32>
    %c-1_i32_6 = arith.constant -1 : i32
    %27 = vector.broadcast %c-1_i32_6 : i32 to vector<1x256xi32>
    %28 = arith.addi %21, %27 : vector<1x256xi32>
    %c16_i32_7 = arith.constant 16 : i32
    %29 = vector.broadcast %c16_i32_7 : i32 to vector<1x256xi32>
    %30 = arith.cmpi slt, %28, %29 : vector<1x256xi32>
    %31 = arith.andi %26, %30 : vector<1x256xi1>
    %cst_8 = arith.constant 0.000000e+00 : f32
    %32 = vector.shape_cast %31 : vector<1x256xi1> to vector<1x256xi1>
    %33 = vector.broadcast %32 : vector<1x256xi1> to vector<4x256xi1>
    %34 = vector.broadcast %cst_8 : f32 to vector<4x256xf32>
    %35 = arith.select %33, %22, %34 : vector<4x256xi1>, vector<4x256xf32>
    %c0_9 = arith.constant 0 : index
    %c0_10 = arith.constant 0 : index
    %36 = vector.load %arg5[%c0_9, %c0_10] : memref<36x256xf32, #tpu.memory_space<vmem>>, vector<4x256xf32>
    tpu.vector_store %arg5[%c0_9, %c0_10], %35 {strides = array<i32>} : memref<36x256xf32, #tpu.memory_space<vmem>>, vector<4x256xf32>,
    %37 = vector.extract_strided_slice %4 {offsets = [0, 112], sizes = [4, 256], strides = [1, 1]} : vector<4x512xf32> to vector<4x256xf32>
    %c0_i32_11 = arith.constant 0 : i32
    %38 = vector.broadcast %c0_i32_11 : i32 to vector<1x256xi32>
    %39 = arith.addi %21, %38 : vector<1x256xi32>
    %c0_i32_12 = arith.constant 0 : i32
    %40 = vector.broadcast %c0_i32_12 : i32 to vector<1x256xi32>
    %41 = arith.cmpi sge, %39, %40 : vector<1x256xi32>
    %c0_i32_13 = arith.constant 0 : i32
    %42 = vector.broadcast %c0_i32_13 : i32 to vector<1x256xi32>
    %43 = arith.addi %21, %42 : vector<1x256xi32>
    %c16_i32_14 = arith.constant 16 : i32
    %44 = vector.broadcast %c16_i32_14 : i32 to vector<1x256xi32>
    %45 = arith.cmpi slt, %43, %44 : vector<1x256xi32>
    %46 = arith.andi %41, %45 : vector<1x256xi1>
    %cst_15 = arith.constant 0.000000e+00 : f32
    %47 = vector.shape_cast %46 : vector<1x256xi1> to vector<1x256xi1>
    %48 = vector.broadcast %47 : vector<1x256xi1> to vector<4x256xi1>
    %49 = vector.broadcast %cst_15 : f32 to vector<4x256xf32>
    %50 = arith.select %48, %37, %49 : vector<4x256xi1>, vector<4x256xf32>
    %c4 = arith.constant 4 : index
    %c0_16 = arith.constant 0 : index
    %51 = vector.load %arg5[%c4, %c0_16] : memref<36x256xf32, #tpu.memory_space<vmem>>, vector<4x256xf32>
    tpu.vector_store %arg5[%c4, %c0_16], %50 {strides = array<i32>} : memref<36x256xf32, #tpu.memory_space<vmem>>, vector<4x256xf32>,
    %52 = vector.extract_strided_slice %4 {offsets = [0, 113], sizes = [4, 256], strides = [1, 1]} : vector<4x512xf32> to vector<4x256xf32>
    %c1_i32_17 = arith.constant 1 : i32
    %53 = vector.broadcast %c1_i32_17 : i32 to vector<1x256xi32>
    %54 = arith.addi %21, %53 : vector<1x256xi32>
    %c0_i32_18 = arith.constant 0 : i32
    %55 = vector.broadcast %c0_i32_18 : i32 to vector<1x256xi32>
    %56 = arith.cmpi sge, %54, %55 : vector<1x256xi32>
    %c1_i32_19 = arith.constant 1 : i32
    %57 = vector.broadcast %c1_i32_19 : i32 to vector<1x256xi32>
    %58 = arith.addi %21, %57 : vector<1x256xi32>
    %c16_i32_20 = arith.constant 16 : i32
    %59 = vector.broadcast %c16_i32_20 : i32 to vector<1x256xi32>
    %60 = arith.cmpi slt, %58, %59 : vector<1x256xi32>
    %61 = arith.andi %56, %60 : vector<1x256xi1>
    %cst_21 = arith.constant 0.000000e+00 : f32
    %62 = vector.shape_cast %61 : vector<1x256xi1> to vector<1x256xi1>
    %63 = vector.broadcast %62 : vector<1x256xi1> to vector<4x256xi1>
    %64 = vector.broadcast %cst_21 : f32 to vector<4x256xf32>
    %65 = arith.select %63, %52, %64 : vector<4x256xi1>, vector<4x256xf32>
    %c8 = arith.constant 8 : index
    %c0_22 = arith.constant 0 : index
    %66 = vector.load %arg5[%c8, %c0_22] : memref<36x256xf32, #tpu.memory_space<vmem>>, vector<4x256xf32>
    tpu.vector_store %arg5[%c8, %c0_22], %65 {strides = array<i32>} : memref<36x256xf32, #tpu.memory_space<vmem>>, vector<4x256xf32>,
    %67 = vector.extract_strided_slice %4 {offsets = [0, 127], sizes = [4, 256], strides = [1, 1]} : vector<4x512xf32> to vector<4x256xf32>
    %c-1_i32_23 = arith.constant -1 : i32
    %68 = vector.broadcast %c-1_i32_23 : i32 to vector<1x256xi32>
    %69 = arith.addi %21, %68 : vector<1x256xi32>
    %c0_i32_24 = arith.constant 0 : i32
    %70 = vector.broadcast %c0_i32_24 : i32 to vector<1x256xi32>
    %71 = arith.cmpi sge, %69, %70 : vector<1x256xi32>
    %c-1_i32_25 = arith.constant -1 : i32
    %72 = vector.broadcast %c-1_i32_25 : i32 to vector<1x256xi32>
    %73 = arith.addi %21, %72 : vector<1x256xi32>
    %c16_i32_26 = arith.constant 16 : i32
    %74 = vector.broadcast %c16_i32_26 : i32 to vector<1x256xi32>
    %75 = arith.cmpi slt, %73, %74 : vector<1x256xi32>
    %76 = arith.andi %71, %75 : vector<1x256xi1>
    %cst_27 = arith.constant 0.000000e+00 : f32
    %77 = vector.shape_cast %76 : vector<1x256xi1> to vector<1x256xi1>
    %78 = vector.broadcast %77 : vector<1x256xi1> to vector<4x256xi1>
    %79 = vector.broadcast %cst_27 : f32 to vector<4x256xf32>
    %80 = arith.select %78, %67, %79 : vector<4x256xi1>, vector<4x256xf32>
    %c12 = arith.constant 12 : index
    %c0_28 = arith.constant 0 : index
    %81 = vector.load %arg5[%c12, %c0_28] : memref<36x256xf32, #tpu.memory_space<vmem>>, vector<4x256xf32>
    tpu.vector_store %arg5[%c12, %c0_28], %80 {strides = array<i32>} : memref<36x256xf32, #tpu.memory_space<vmem>>, vector<4x256xf32>,
    %82 = vector.extract_strided_slice %4 {offsets = [0, 128], sizes = [4, 256], strides = [1, 1]} : vector<4x512xf32> to vector<4x256xf32>
    %c0_i32_29 = arith.constant 0 : i32
    %83 = vector.broadcast %c0_i32_29 : i32 to vector<1x256xi32>
    %84 = arith.addi %21, %83 : vector<1x256xi32>
    %c0_i32_30 = arith.constant 0 : i32
    %85 = vector.broadcast %c0_i32_30 : i32 to vector<1x256xi32>
    %86 = arith.cmpi sge, %84, %85 : vector<1x256xi32>
    %c0_i32_31 = arith.constant 0 : i32
    %87 = vector.broadcast %c0_i32_31 : i32 to vector<1x256xi32>
    %88 = arith.addi %21, %87 : vector<1x256xi32>
    %c16_i32_32 = arith.constant 16 : i32
    %89 = vector.broadcast %c16_i32_32 : i32 to vector<1x256xi32>
    %90 = arith.cmpi slt, %88, %89 : vector<1x256xi32>
    %91 = arith.andi %86, %90 : vector<1x256xi1>
    %cst_33 = arith.constant 0.000000e+00 : f32
    %92 = vector.shape_cast %91 : vector<1x256xi1> to vector<1x256xi1>
    %93 = vector.broadcast %92 : vector<1x256xi1> to vector<4x256xi1>
    %94 = vector.broadcast %cst_33 : f32 to vector<4x256xf32>
    %95 = arith.select %93, %82, %94 : vector<4x256xi1>, vector<4x256xf32>
    %c16 = arith.constant 16 : index
    %c0_34 = arith.constant 0 : index
    %96 = vector.load %arg5[%c16, %c0_34] : memref<36x256xf32, #tpu.memory_space<vmem>>, vector<4x256xf32>
    tpu.vector_store %arg5[%c16, %c0_34], %95 {strides = array<i32>} : memref<36x256xf32, #tpu.memory_space<vmem>>, vector<4x256xf32>,
    %97 = vector.extract_strided_slice %4 {offsets = [0, 129], sizes = [4, 256], strides = [1, 1]} : vector<4x512xf32> to vector<4x256xf32>
    %c1_i32_35 = arith.constant 1 : i32
    %98 = vector.broadcast %c1_i32_35 : i32 to vector<1x256xi32>
    %99 = arith.addi %21, %98 : vector<1x256xi32>
    %c0_i32_36 = arith.constant 0 : i32
    %100 = vector.broadcast %c0_i32_36 : i32 to vector<1x256xi32>
    %101 = arith.cmpi sge, %99, %100 : vector<1x256xi32>
    %c1_i32_37 = arith.constant 1 : i32
    %102 = vector.broadcast %c1_i32_37 : i32 to vector<1x256xi32>
    %103 = arith.addi %21, %102 : vector<1x256xi32>
    %c16_i32_38 = arith.constant 16 : i32
    %104 = vector.broadcast %c16_i32_38 : i32 to vector<1x256xi32>
    %105 = arith.cmpi slt, %103, %104 : vector<1x256xi32>
    %106 = arith.andi %101, %105 : vector<1x256xi1>
    %cst_39 = arith.constant 0.000000e+00 : f32
    %107 = vector.shape_cast %106 : vector<1x256xi1> to vector<1x256xi1>
    %108 = vector.broadcast %107 : vector<1x256xi1> to vector<4x256xi1>
    %109 = vector.broadcast %cst_39 : f32 to vector<4x256xf32>
    %110 = arith.select %108, %97, %109 : vector<4x256xi1>, vector<4x256xf32>
    %c20 = arith.constant 20 : index
    %c0_40 = arith.constant 0 : index
    %111 = vector.load %arg5[%c20, %c0_40] : memref<36x256xf32, #tpu.memory_space<vmem>>, vector<4x256xf32>
    tpu.vector_store %arg5[%c20, %c0_40], %110 {strides = array<i32>} : memref<36x256xf32, #tpu.memory_space<vmem>>, vector<4x256xf32>,
    %112 = vector.extract_strided_slice %4 {offsets = [0, 143], sizes = [4, 256], strides = [1, 1]} : vector<4x512xf32> to vector<4x256xf32>
    %c-1_i32_41 = arith.constant -1 : i32
    %113 = vector.broadcast %c-1_i32_41 : i32 to vector<1x256xi32>
    %114 = arith.addi %21, %113 : vector<1x256xi32>
    %c0_i32_42 = arith.constant 0 : i32
    %115 = vector.broadcast %c0_i32_42 : i32 to vector<1x256xi32>
    %116 = arith.cmpi sge, %114, %115 : vector<1x256xi32>
    %c-1_i32_43 = arith.constant -1 : i32
    %117 = vector.broadcast %c-1_i32_43 : i32 to vector<1x256xi32>
    %118 = arith.addi %21, %117 : vector<1x256xi32>
    %c16_i32_44 = arith.constant 16 : i32
    %119 = vector.broadcast %c16_i32_44 : i32 to vector<1x256xi32>
    %120 = arith.cmpi slt, %118, %119 : vector<1x256xi32>
    %121 = arith.andi %116, %120 : vector<1x256xi1>
    %cst_45 = arith.constant 0.000000e+00 : f32
    %122 = vector.shape_cast %121 : vector<1x256xi1> to vector<1x256xi1>
    %123 = vector.broadcast %122 : vector<1x256xi1> to vector<4x256xi1>
    %124 = vector.broadcast %cst_45 : f32 to vector<4x256xf32>
    %125 = arith.select %123, %112, %124 : vector<4x256xi1>, vector<4x256xf32>
    %c24 = arith.constant 24 : index
    %c0_46 = arith.constant 0 : index
    %126 = vector.load %arg5[%c24, %c0_46] : memref<36x256xf32, #tpu.memory_space<vmem>>, vector<4x256xf32>
    tpu.vector_store %arg5[%c24, %c0_46], %125 {strides = array<i32>} : memref<36x256xf32, #tpu.memory_space<vmem>>, vector<4x256xf32>,
    %127 = vector.extract_strided_slice %4 {offsets = [0, 144], sizes = [4, 256], strides = [1, 1]} : vector<4x512xf32> to vector<4x256xf32>
    %c0_i32_47 = arith.constant 0 : i32
    %128 = vector.broadcast %c0_i32_47 : i32 to vector<1x256xi32>
    %129 = arith.addi %21, %128 : vector<1x256xi32>
    %c0_i32_48 = arith.constant 0 : i32
    %130 = vector.broadcast %c0_i32_48 : i32 to vector<1x256xi32>
    %131 = arith.cmpi sge, %129, %130 : vector<1x256xi32>
    %c0_i32_49 = arith.constant 0 : i32
    %132 = vector.broadcast %c0_i32_49 : i32 to vector<1x256xi32>
    %133 = arith.addi %21, %132 : vector<1x256xi32>
    %c16_i32_50 = arith.constant 16 : i32
    %134 = vector.broadcast %c16_i32_50 : i32 to vector<1x256xi32>
    %135 = arith.cmpi slt, %133, %134 : vector<1x256xi32>
    %136 = arith.andi %131, %135 : vector<1x256xi1>
    %cst_51 = arith.constant 0.000000e+00 : f32
    %137 = vector.shape_cast %136 : vector<1x256xi1> to vector<1x256xi1>
    %138 = vector.broadcast %137 : vector<1x256xi1> to vector<4x256xi1>
    %139 = vector.broadcast %cst_51 : f32 to vector<4x256xf32>
    %140 = arith.select %138, %127, %139 : vector<4x256xi1>, vector<4x256xf32>
    %c28 = arith.constant 28 : index
    %c0_52 = arith.constant 0 : index
    %141 = vector.load %arg5[%c28, %c0_52] : memref<36x256xf32, #tpu.memory_space<vmem>>, vector<4x256xf32>
    tpu.vector_store %arg5[%c28, %c0_52], %140 {strides = array<i32>} : memref<36x256xf32, #tpu.memory_space<vmem>>, vector<4x256xf32>,
    %142 = vector.extract_strided_slice %4 {offsets = [0, 145], sizes = [4, 256], strides = [1, 1]} : vector<4x512xf32> to vector<4x256xf32>
    %c1_i32_53 = arith.constant 1 : i32
    %143 = vector.broadcast %c1_i32_53 : i32 to vector<1x256xi32>
    %144 = arith.addi %21, %143 : vector<1x256xi32>
    %c0_i32_54 = arith.constant 0 : i32
    %145 = vector.broadcast %c0_i32_54 : i32 to vector<1x256xi32>
    %146 = arith.cmpi sge, %144, %145 : vector<1x256xi32>
    %c1_i32_55 = arith.constant 1 : i32
    %147 = vector.broadcast %c1_i32_55 : i32 to vector<1x256xi32>
    %148 = arith.addi %21, %147 : vector<1x256xi32>
    %c16_i32_56 = arith.constant 16 : i32
    %149 = vector.broadcast %c16_i32_56 : i32 to vector<1x256xi32>
    %150 = arith.cmpi slt, %148, %149 : vector<1x256xi32>
    %151 = arith.andi %146, %150 : vector<1x256xi1>
    %cst_57 = arith.constant 0.000000e+00 : f32
    %152 = vector.shape_cast %151 : vector<1x256xi1> to vector<1x256xi1>
    %153 = vector.broadcast %152 : vector<1x256xi1> to vector<4x256xi1>
    %154 = vector.broadcast %cst_57 : f32 to vector<4x256xf32>
    %155 = arith.select %153, %142, %154 : vector<4x256xi1>, vector<4x256xf32>
    %c32 = arith.constant 32 : index
    %c0_58 = arith.constant 0 : index
    %156 = vector.load %arg5[%c32, %c0_58] : memref<36x256xf32, #tpu.memory_space<vmem>>, vector<4x256xf32>
    tpu.vector_store %arg5[%c32, %c0_58], %155 {strides = array<i32>} : memref<36x256xf32, #tpu.memory_space<vmem>>, vector<4x256xf32>,
    %c0_59 = arith.constant 0 : index
    %c0_60 = arith.constant 0 : index
    %157 = vector.load %arg2[%c0_59, %c0_60] : memref<18x36xf32, #tpu.memory_space<vmem>>, vector<18x36xf32>
    %c0_61 = arith.constant 0 : index
    %c0_62 = arith.constant 0 : index
    %158 = vector.load %arg5[%c0_61, %c0_62] : memref<36x256xf32, #tpu.memory_space<vmem>>, vector<36x256xf32>
    %cst_63 = arith.constant dense<0.000000e+00> : vector<18x256xf32>
    %159 = tpu.matmul %157, %158, %cst_63 {dimension_numbers = #tpu.dot_dimension_numbers<[1], [0], [0], [1], [0, 0, 1, 1], [], []>} : vector<18x36xf32>, vector<36x256xf32>, vector<18x256xf32> -> vector<18x256xf32>
    %c0_64 = arith.constant 0 : index
    %c0_65 = arith.constant 0 : index
    %160 = vector.load %arg3[%c0_64, %c0_65] : memref<18x1xf32, #tpu.memory_space<vmem>>, vector<18x1xf32>
    %161 = vector.broadcast %160 : vector<18x1xf32> to vector<18x256xf32>
    %162 = arith.addf %159, %161 : vector<18x256xf32>
    %c0_66 = arith.constant 0 : index
    %c0_67 = arith.constant 0 : index
    %c0_68 = arith.constant 0 : index
    %163 = vector.load %arg4[%c0_66, %c0_67, %c0_68] : memref<1x18x256xf32, #tpu.memory_space<vmem>>, vector<1x18x256xf32>
    %164 = vector.shape_cast %163 : vector<1x18x256xf32> to vector<18x256xf32>
    %165 = vector.shape_cast %162 : vector<18x256xf32> to vector<1x18x256xf32>
    tpu.vector_store %arg4[%c0_66, %c0_67, %c0_68], %165 {strides = array<i32>} : memref<1x18x256xf32, #tpu.memory_space<vmem>>, vector<1x18x256xf32>,
    return
  }
  func.func @transform_0(%arg0: i32) -> (i32, i32, i32) {
    %c0_i32 = arith.constant 0 : i32
    %c0_i32_0 = arith.constant 0 : i32
    %c0_i32_1 = arith.constant 0 : i32
    return %arg0, %c0_i32, %c0_i32_0 : i32, i32, i32
  }
  func.func @transform_1(%arg0: i32) -> (i32, i32) {
    %c0_i32 = arith.constant 0 : i32
    %c0_i32_0 = arith.constant 0 : i32
    %c0_i32_1 = arith.constant 0 : i32
    return %c0_i32, %c0_i32_0 : i32, i32
  }
  func.func @transform_2(%arg0: i32) -> (i32, i32) {
    %c0_i32 = arith.constant 0 : i32
    %c0_i32_0 = arith.constant 0 : i32
    %c0_i32_1 = arith.constant 0 : i32
    return %c0_i32, %c0_i32_0 : i32, i32
  }
  func.func @transform_3(%arg0: i32) -> (i32, i32, i32) {
    %c0_i32 = arith.constant 0 : i32
    %c0_i32_0 = arith.constant 0 : i32
    %c0_i32_1 = arith.constant 0 : i32
    return %arg0, %c0_i32, %c0_i32_0 : i32, i32, i32
  }
}

module attributes {stable_mosaic.version = 11 : i64} {
  func.func @_conv_tail_kernel(%arg0: i32, %arg1: i32, %arg2: memref<1x36x256xbf16, #tpu.memory_space<vmem>>, %arg3: memref<4x36xf32, #tpu.memory_space<vmem>>, %arg4: memref<1x4x256xbf16, #tpu.memory_space<vmem>>) attributes {dimension_semantics = [#tpu.dimension_semantics<parallel>, #tpu.dimension_semantics<parallel>], iteration_bounds = array<i64: 2, 1>, scalar_prefetch = 0 : i64, scratch_operands = 0 : i64, tpu.core_type = #tpu.core_type<tc>, window_params = [{transform_indices = @transform_0, window_bounds = array<i64: 1, 36, 256>}, {pipeline_mode = #tpu.pipeline_mode<synchronous>, transform_indices = @transform_1, window_bounds = array<i64: 4, 36>}, {transform_indices = @transform_2, window_bounds = array<i64: 1, 4, 256>}]} {
    %c0 = arith.constant 0 : index
    %c0_0 = arith.constant 0 : index
    %0 = vector.load %arg3[%c0, %c0_0] : memref<4x36xf32, #tpu.memory_space<vmem>>, vector<4x36xf32>
    %c0_1 = arith.constant 0 : index
    %c0_2 = arith.constant 0 : index
    %c0_3 = arith.constant 0 : index
    %1 = vector.load %arg2[%c0_1, %c0_2, %c0_3] : memref<1x36x256xbf16, #tpu.memory_space<vmem>>, vector<1x36x256xbf16>
    %2 = vector.shape_cast %1 : vector<1x36x256xbf16> to vector<36x256xbf16>
    %3 = arith.extf %2 : vector<36x256xbf16> to vector<36x256xf32>
    %cst = arith.constant dense<0.000000e+00> : vector<4x256xf32>
    %4 = tpu.matmul %0, %3, %cst {dimension_numbers = #tpu.dot_dimension_numbers<[1], [0], [0], [1], [0, 0, 1, 1], [], []>} : vector<4x36xf32>, vector<36x256xf32>, vector<4x256xf32> -> vector<4x256xf32>
    %5 = arith.truncf %4 : vector<4x256xf32> to vector<4x256xbf16>
    %c0_4 = arith.constant 0 : index
    %c0_5 = arith.constant 0 : index
    %c0_6 = arith.constant 0 : index
    %6 = vector.load %arg4[%c0_4, %c0_5, %c0_6] : memref<1x4x256xbf16, #tpu.memory_space<vmem>>, vector<1x4x256xbf16>
    %7 = vector.shape_cast %6 : vector<1x4x256xbf16> to vector<4x256xbf16>
    %8 = vector.shape_cast %5 : vector<4x256xbf16> to vector<1x4x256xbf16>
    tpu.vector_store %arg4[%c0_4, %c0_5, %c0_6], %8 {strides = array<i32>} : memref<1x4x256xbf16, #tpu.memory_space<vmem>>, vector<1x4x256xbf16>,
    return
  }
  func.func @transform_0(%arg0: i32, %arg1: i32) -> (i32, i32, i32) {
    %c0_i32 = arith.constant 0 : i32
    %c0_i32_0 = arith.constant 0 : i32
    return %arg0, %c0_i32, %arg1 : i32, i32, i32
  }
  func.func @transform_1(%arg0: i32, %arg1: i32) -> (i32, i32) {
    %c0_i32 = arith.constant 0 : i32
    %c0_i32_0 = arith.constant 0 : i32
    %c0_i32_1 = arith.constant 0 : i32
    return %c0_i32, %c0_i32_0 : i32, i32
  }
  func.func @transform_2(%arg0: i32, %arg1: i32) -> (i32, i32, i32) {
    %c0_i32 = arith.constant 0 : i32
    %c0_i32_0 = arith.constant 0 : i32
    return %arg0, %c0_i32, %arg1 : i32, i32, i32
  }
}

module attributes {stable_mosaic.version = 11 : i64} {
  func.func @_offset_conv_kernel(%arg0: i32, %arg1: memref<1x4x256xbf16, #tpu.memory_space<vmem>>, %arg2: memref<18x36xf32, #tpu.memory_space<vmem>>, %arg3: memref<18x1xf32, #tpu.memory_space<vmem>>, %arg4: memref<1x18x256xf32, #tpu.memory_space<vmem>>, %arg5: memref<36x256xf32, #tpu.memory_space<vmem>>) attributes {dimension_semantics = [#tpu.dimension_semantics<parallel>], iteration_bounds = array<i64: 2>, scalar_prefetch = 0 : i64, scratch_operands = 1 : i64, tpu.core_type = #tpu.core_type<tc>, window_params = [{transform_indices = @transform_0, window_bounds = array<i64: 1, 4, 256>}, {pipeline_mode = #tpu.pipeline_mode<synchronous>, transform_indices = @transform_1, window_bounds = array<i64: 18, 36>}, {pipeline_mode = #tpu.pipeline_mode<synchronous>, transform_indices = @transform_2, window_bounds = array<i64: 18, 1>}, {transform_indices = @transform_3, window_bounds = array<i64: 1, 18, 256>}]} {
    %c0 = arith.constant 0 : index
    %c0_0 = arith.constant 0 : index
    %c0_1 = arith.constant 0 : index
    %0 = vector.load %arg1[%c0, %c0_0, %c0_1] : memref<1x4x256xbf16, #tpu.memory_space<vmem>>, vector<1x4x256xbf16>
    %1 = vector.shape_cast %0 : vector<1x4x256xbf16> to vector<4x256xbf16>
    %2 = arith.extf %1 : vector<4x256xbf16> to vector<4x256xf32>
    %cst = arith.constant 0.000000e+00 : f32
    %3 = vector.broadcast %cst : f32 to vector<4x128xf32>
    %4 = tpu.concatenate %3, %2, %3 in 1 : vector<4x128xf32>, vector<4x256xf32>, vector<4x128xf32> -> vector<4x512xf32>
    %5 = tpu.iota {dimensions = array<i32: 1>} : vector<1x256xi32>
    %c16_i32 = arith.constant 16 : i32
    %c0_i32 = arith.constant 0 : i32
    %6 = arith.cmpi eq, %c16_i32, %c0_i32 : i32
    %c1_i32 = arith.constant 1 : i32
    %7 = arith.select %6, %c1_i32, %c16_i32 : i32
    %8 = vector.broadcast %7 : i32 to vector<1x256xi32>
    %9 = arith.remsi %5, %8 : vector<1x256xi32>
    %c0_i32_2 = arith.constant 0 : i32
    %10 = vector.broadcast %c0_i32_2 : i32 to vector<1x256xi32>
    %11 = arith.cmpi ne, %9, %10 : vector<1x256xi32>
    %c0_i32_3 = arith.constant 0 : i32
    %12 = vector.broadcast %c0_i32_3 : i32 to vector<1x256xi32>
    %13 = arith.cmpi slt, %9, %12 : vector<1x256xi32>
    %c0_i32_4 = arith.constant 0 : i32
    %14 = arith.cmpi slt, %7, %c0_i32_4 : i32
    %15 = vector.broadcast %14 : i1 to vector<1x256xi1>
    %16 = vector.broadcast %15 : vector<1x256xi1> to vector<1x256xi1>
    %17 = arith.xori %13, %16 : vector<1x256xi1>
    %18 = arith.andi %17, %11 : vector<1x256xi1>
    %19 = vector.broadcast %7 : i32 to vector<1x256xi32>
    %20 = arith.addi %9, %19 : vector<1x256xi32>
    %21 = arith.select %18, %20, %9 : vector<1x256xi1>, vector<1x256xi32>
    %22 = vector.extract_strided_slice %4 {offsets = [0, 111], sizes = [4, 256], strides = [1, 1]} : vector<4x512xf32> to vector<4x256xf32>
    %c-1_i32 = arith.constant -1 : i32
    %23 = vector.broadcast %c-1_i32 : i32 to vector<1x256xi32>
    %24 = arith.addi %21, %23 : vector<1x256xi32>
    %c0_i32_5 = arith.constant 0 : i32
    %25 = vector.broadcast %c0_i32_5 : i32 to vector<1x256xi32>
    %26 = arith.cmpi sge, %24, %25 : vector<1x256xi32>
    %c-1_i32_6 = arith.constant -1 : i32
    %27 = vector.broadcast %c-1_i32_6 : i32 to vector<1x256xi32>
    %28 = arith.addi %21, %27 : vector<1x256xi32>
    %c16_i32_7 = arith.constant 16 : i32
    %29 = vector.broadcast %c16_i32_7 : i32 to vector<1x256xi32>
    %30 = arith.cmpi slt, %28, %29 : vector<1x256xi32>
    %31 = arith.andi %26, %30 : vector<1x256xi1>
    %cst_8 = arith.constant 0.000000e+00 : f32
    %32 = vector.shape_cast %31 : vector<1x256xi1> to vector<1x256xi1>
    %33 = vector.broadcast %32 : vector<1x256xi1> to vector<4x256xi1>
    %34 = vector.broadcast %cst_8 : f32 to vector<4x256xf32>
    %35 = arith.select %33, %22, %34 : vector<4x256xi1>, vector<4x256xf32>
    %c0_9 = arith.constant 0 : index
    %c0_10 = arith.constant 0 : index
    %36 = vector.load %arg5[%c0_9, %c0_10] : memref<36x256xf32, #tpu.memory_space<vmem>>, vector<4x256xf32>
    tpu.vector_store %arg5[%c0_9, %c0_10], %35 {strides = array<i32>} : memref<36x256xf32, #tpu.memory_space<vmem>>, vector<4x256xf32>,
    %37 = vector.extract_strided_slice %4 {offsets = [0, 112], sizes = [4, 256], strides = [1, 1]} : vector<4x512xf32> to vector<4x256xf32>
    %c0_i32_11 = arith.constant 0 : i32
    %38 = vector.broadcast %c0_i32_11 : i32 to vector<1x256xi32>
    %39 = arith.addi %21, %38 : vector<1x256xi32>
    %c0_i32_12 = arith.constant 0 : i32
    %40 = vector.broadcast %c0_i32_12 : i32 to vector<1x256xi32>
    %41 = arith.cmpi sge, %39, %40 : vector<1x256xi32>
    %c0_i32_13 = arith.constant 0 : i32
    %42 = vector.broadcast %c0_i32_13 : i32 to vector<1x256xi32>
    %43 = arith.addi %21, %42 : vector<1x256xi32>
    %c16_i32_14 = arith.constant 16 : i32
    %44 = vector.broadcast %c16_i32_14 : i32 to vector<1x256xi32>
    %45 = arith.cmpi slt, %43, %44 : vector<1x256xi32>
    %46 = arith.andi %41, %45 : vector<1x256xi1>
    %cst_15 = arith.constant 0.000000e+00 : f32
    %47 = vector.shape_cast %46 : vector<1x256xi1> to vector<1x256xi1>
    %48 = vector.broadcast %47 : vector<1x256xi1> to vector<4x256xi1>
    %49 = vector.broadcast %cst_15 : f32 to vector<4x256xf32>
    %50 = arith.select %48, %37, %49 : vector<4x256xi1>, vector<4x256xf32>
    %c4 = arith.constant 4 : index
    %c0_16 = arith.constant 0 : index
    %51 = vector.load %arg5[%c4, %c0_16] : memref<36x256xf32, #tpu.memory_space<vmem>>, vector<4x256xf32>
    tpu.vector_store %arg5[%c4, %c0_16], %50 {strides = array<i32>} : memref<36x256xf32, #tpu.memory_space<vmem>>, vector<4x256xf32>,
    %52 = vector.extract_strided_slice %4 {offsets = [0, 113], sizes = [4, 256], strides = [1, 1]} : vector<4x512xf32> to vector<4x256xf32>
    %c1_i32_17 = arith.constant 1 : i32
    %53 = vector.broadcast %c1_i32_17 : i32 to vector<1x256xi32>
    %54 = arith.addi %21, %53 : vector<1x256xi32>
    %c0_i32_18 = arith.constant 0 : i32
    %55 = vector.broadcast %c0_i32_18 : i32 to vector<1x256xi32>
    %56 = arith.cmpi sge, %54, %55 : vector<1x256xi32>
    %c1_i32_19 = arith.constant 1 : i32
    %57 = vector.broadcast %c1_i32_19 : i32 to vector<1x256xi32>
    %58 = arith.addi %21, %57 : vector<1x256xi32>
    %c16_i32_20 = arith.constant 16 : i32
    %59 = vector.broadcast %c16_i32_20 : i32 to vector<1x256xi32>
    %60 = arith.cmpi slt, %58, %59 : vector<1x256xi32>
    %61 = arith.andi %56, %60 : vector<1x256xi1>
    %cst_21 = arith.constant 0.000000e+00 : f32
    %62 = vector.shape_cast %61 : vector<1x256xi1> to vector<1x256xi1>
    %63 = vector.broadcast %62 : vector<1x256xi1> to vector<4x256xi1>
    %64 = vector.broadcast %cst_21 : f32 to vector<4x256xf32>
    %65 = arith.select %63, %52, %64 : vector<4x256xi1>, vector<4x256xf32>
    %c8 = arith.constant 8 : index
    %c0_22 = arith.constant 0 : index
    %66 = vector.load %arg5[%c8, %c0_22] : memref<36x256xf32, #tpu.memory_space<vmem>>, vector<4x256xf32>
    tpu.vector_store %arg5[%c8, %c0_22], %65 {strides = array<i32>} : memref<36x256xf32, #tpu.memory_space<vmem>>, vector<4x256xf32>,
    %67 = vector.extract_strided_slice %4 {offsets = [0, 127], sizes = [4, 256], strides = [1, 1]} : vector<4x512xf32> to vector<4x256xf32>
    %c-1_i32_23 = arith.constant -1 : i32
    %68 = vector.broadcast %c-1_i32_23 : i32 to vector<1x256xi32>
    %69 = arith.addi %21, %68 : vector<1x256xi32>
    %c0_i32_24 = arith.constant 0 : i32
    %70 = vector.broadcast %c0_i32_24 : i32 to vector<1x256xi32>
    %71 = arith.cmpi sge, %69, %70 : vector<1x256xi32>
    %c-1_i32_25 = arith.constant -1 : i32
    %72 = vector.broadcast %c-1_i32_25 : i32 to vector<1x256xi32>
    %73 = arith.addi %21, %72 : vector<1x256xi32>
    %c16_i32_26 = arith.constant 16 : i32
    %74 = vector.broadcast %c16_i32_26 : i32 to vector<1x256xi32>
    %75 = arith.cmpi slt, %73, %74 : vector<1x256xi32>
    %76 = arith.andi %71, %75 : vector<1x256xi1>
    %cst_27 = arith.constant 0.000000e+00 : f32
    %77 = vector.shape_cast %76 : vector<1x256xi1> to vector<1x256xi1>
    %78 = vector.broadcast %77 : vector<1x256xi1> to vector<4x256xi1>
    %79 = vector.broadcast %cst_27 : f32 to vector<4x256xf32>
    %80 = arith.select %78, %67, %79 : vector<4x256xi1>, vector<4x256xf32>
    %c12 = arith.constant 12 : index
    %c0_28 = arith.constant 0 : index
    %81 = vector.load %arg5[%c12, %c0_28] : memref<36x256xf32, #tpu.memory_space<vmem>>, vector<4x256xf32>
    tpu.vector_store %arg5[%c12, %c0_28], %80 {strides = array<i32>} : memref<36x256xf32, #tpu.memory_space<vmem>>, vector<4x256xf32>,
    %82 = vector.extract_strided_slice %4 {offsets = [0, 128], sizes = [4, 256], strides = [1, 1]} : vector<4x512xf32> to vector<4x256xf32>
    %c0_i32_29 = arith.constant 0 : i32
    %83 = vector.broadcast %c0_i32_29 : i32 to vector<1x256xi32>
    %84 = arith.addi %21, %83 : vector<1x256xi32>
    %c0_i32_30 = arith.constant 0 : i32
    %85 = vector.broadcast %c0_i32_30 : i32 to vector<1x256xi32>
    %86 = arith.cmpi sge, %84, %85 : vector<1x256xi32>
    %c0_i32_31 = arith.constant 0 : i32
    %87 = vector.broadcast %c0_i32_31 : i32 to vector<1x256xi32>
    %88 = arith.addi %21, %87 : vector<1x256xi32>
    %c16_i32_32 = arith.constant 16 : i32
    %89 = vector.broadcast %c16_i32_32 : i32 to vector<1x256xi32>
    %90 = arith.cmpi slt, %88, %89 : vector<1x256xi32>
    %91 = arith.andi %86, %90 : vector<1x256xi1>
    %cst_33 = arith.constant 0.000000e+00 : f32
    %92 = vector.shape_cast %91 : vector<1x256xi1> to vector<1x256xi1>
    %93 = vector.broadcast %92 : vector<1x256xi1> to vector<4x256xi1>
    %94 = vector.broadcast %cst_33 : f32 to vector<4x256xf32>
    %95 = arith.select %93, %82, %94 : vector<4x256xi1>, vector<4x256xf32>
    %c16 = arith.constant 16 : index
    %c0_34 = arith.constant 0 : index
    %96 = vector.load %arg5[%c16, %c0_34] : memref<36x256xf32, #tpu.memory_space<vmem>>, vector<4x256xf32>
    tpu.vector_store %arg5[%c16, %c0_34], %95 {strides = array<i32>} : memref<36x256xf32, #tpu.memory_space<vmem>>, vector<4x256xf32>,
    %97 = vector.extract_strided_slice %4 {offsets = [0, 129], sizes = [4, 256], strides = [1, 1]} : vector<4x512xf32> to vector<4x256xf32>
    %c1_i32_35 = arith.constant 1 : i32
    %98 = vector.broadcast %c1_i32_35 : i32 to vector<1x256xi32>
    %99 = arith.addi %21, %98 : vector<1x256xi32>
    %c0_i32_36 = arith.constant 0 : i32
    %100 = vector.broadcast %c0_i32_36 : i32 to vector<1x256xi32>
    %101 = arith.cmpi sge, %99, %100 : vector<1x256xi32>
    %c1_i32_37 = arith.constant 1 : i32
    %102 = vector.broadcast %c1_i32_37 : i32 to vector<1x256xi32>
    %103 = arith.addi %21, %102 : vector<1x256xi32>
    %c16_i32_38 = arith.constant 16 : i32
    %104 = vector.broadcast %c16_i32_38 : i32 to vector<1x256xi32>
    %105 = arith.cmpi slt, %103, %104 : vector<1x256xi32>
    %106 = arith.andi %101, %105 : vector<1x256xi1>
    %cst_39 = arith.constant 0.000000e+00 : f32
    %107 = vector.shape_cast %106 : vector<1x256xi1> to vector<1x256xi1>
    %108 = vector.broadcast %107 : vector<1x256xi1> to vector<4x256xi1>
    %109 = vector.broadcast %cst_39 : f32 to vector<4x256xf32>
    %110 = arith.select %108, %97, %109 : vector<4x256xi1>, vector<4x256xf32>
    %c20 = arith.constant 20 : index
    %c0_40 = arith.constant 0 : index
    %111 = vector.load %arg5[%c20, %c0_40] : memref<36x256xf32, #tpu.memory_space<vmem>>, vector<4x256xf32>
    tpu.vector_store %arg5[%c20, %c0_40], %110 {strides = array<i32>} : memref<36x256xf32, #tpu.memory_space<vmem>>, vector<4x256xf32>,
    %112 = vector.extract_strided_slice %4 {offsets = [0, 143], sizes = [4, 256], strides = [1, 1]} : vector<4x512xf32> to vector<4x256xf32>
    %c-1_i32_41 = arith.constant -1 : i32
    %113 = vector.broadcast %c-1_i32_41 : i32 to vector<1x256xi32>
    %114 = arith.addi %21, %113 : vector<1x256xi32>
    %c0_i32_42 = arith.constant 0 : i32
    %115 = vector.broadcast %c0_i32_42 : i32 to vector<1x256xi32>
    %116 = arith.cmpi sge, %114, %115 : vector<1x256xi32>
    %c-1_i32_43 = arith.constant -1 : i32
    %117 = vector.broadcast %c-1_i32_43 : i32 to vector<1x256xi32>
    %118 = arith.addi %21, %117 : vector<1x256xi32>
    %c16_i32_44 = arith.constant 16 : i32
    %119 = vector.broadcast %c16_i32_44 : i32 to vector<1x256xi32>
    %120 = arith.cmpi slt, %118, %119 : vector<1x256xi32>
    %121 = arith.andi %116, %120 : vector<1x256xi1>
    %cst_45 = arith.constant 0.000000e+00 : f32
    %122 = vector.shape_cast %121 : vector<1x256xi1> to vector<1x256xi1>
    %123 = vector.broadcast %122 : vector<1x256xi1> to vector<4x256xi1>
    %124 = vector.broadcast %cst_45 : f32 to vector<4x256xf32>
    %125 = arith.select %123, %112, %124 : vector<4x256xi1>, vector<4x256xf32>
    %c24 = arith.constant 24 : index
    %c0_46 = arith.constant 0 : index
    %126 = vector.load %arg5[%c24, %c0_46] : memref<36x256xf32, #tpu.memory_space<vmem>>, vector<4x256xf32>
    tpu.vector_store %arg5[%c24, %c0_46], %125 {strides = array<i32>} : memref<36x256xf32, #tpu.memory_space<vmem>>, vector<4x256xf32>,
    %127 = vector.extract_strided_slice %4 {offsets = [0, 144], sizes = [4, 256], strides = [1, 1]} : vector<4x512xf32> to vector<4x256xf32>
    %c0_i32_47 = arith.constant 0 : i32
    %128 = vector.broadcast %c0_i32_47 : i32 to vector<1x256xi32>
    %129 = arith.addi %21, %128 : vector<1x256xi32>
    %c0_i32_48 = arith.constant 0 : i32
    %130 = vector.broadcast %c0_i32_48 : i32 to vector<1x256xi32>
    %131 = arith.cmpi sge, %129, %130 : vector<1x256xi32>
    %c0_i32_49 = arith.constant 0 : i32
    %132 = vector.broadcast %c0_i32_49 : i32 to vector<1x256xi32>
    %133 = arith.addi %21, %132 : vector<1x256xi32>
    %c16_i32_50 = arith.constant 16 : i32
    %134 = vector.broadcast %c16_i32_50 : i32 to vector<1x256xi32>
    %135 = arith.cmpi slt, %133, %134 : vector<1x256xi32>
    %136 = arith.andi %131, %135 : vector<1x256xi1>
    %cst_51 = arith.constant 0.000000e+00 : f32
    %137 = vector.shape_cast %136 : vector<1x256xi1> to vector<1x256xi1>
    %138 = vector.broadcast %137 : vector<1x256xi1> to vector<4x256xi1>
    %139 = vector.broadcast %cst_51 : f32 to vector<4x256xf32>
    %140 = arith.select %138, %127, %139 : vector<4x256xi1>, vector<4x256xf32>
    %c28 = arith.constant 28 : index
    %c0_52 = arith.constant 0 : index
    %141 = vector.load %arg5[%c28, %c0_52] : memref<36x256xf32, #tpu.memory_space<vmem>>, vector<4x256xf32>
    tpu.vector_store %arg5[%c28, %c0_52], %140 {strides = array<i32>} : memref<36x256xf32, #tpu.memory_space<vmem>>, vector<4x256xf32>,
    %142 = vector.extract_strided_slice %4 {offsets = [0, 145], sizes = [4, 256], strides = [1, 1]} : vector<4x512xf32> to vector<4x256xf32>
    %c1_i32_53 = arith.constant 1 : i32
    %143 = vector.broadcast %c1_i32_53 : i32 to vector<1x256xi32>
    %144 = arith.addi %21, %143 : vector<1x256xi32>
    %c0_i32_54 = arith.constant 0 : i32
    %145 = vector.broadcast %c0_i32_54 : i32 to vector<1x256xi32>
    %146 = arith.cmpi sge, %144, %145 : vector<1x256xi32>
    %c1_i32_55 = arith.constant 1 : i32
    %147 = vector.broadcast %c1_i32_55 : i32 to vector<1x256xi32>
    %148 = arith.addi %21, %147 : vector<1x256xi32>
    %c16_i32_56 = arith.constant 16 : i32
    %149 = vector.broadcast %c16_i32_56 : i32 to vector<1x256xi32>
    %150 = arith.cmpi slt, %148, %149 : vector<1x256xi32>
    %151 = arith.andi %146, %150 : vector<1x256xi1>
    %cst_57 = arith.constant 0.000000e+00 : f32
    %152 = vector.shape_cast %151 : vector<1x256xi1> to vector<1x256xi1>
    %153 = vector.broadcast %152 : vector<1x256xi1> to vector<4x256xi1>
    %154 = vector.broadcast %cst_57 : f32 to vector<4x256xf32>
    %155 = arith.select %153, %142, %154 : vector<4x256xi1>, vector<4x256xf32>
    %c32 = arith.constant 32 : index
    %c0_58 = arith.constant 0 : index
    %156 = vector.load %arg5[%c32, %c0_58] : memref<36x256xf32, #tpu.memory_space<vmem>>, vector<4x256xf32>
    tpu.vector_store %arg5[%c32, %c0_58], %155 {strides = array<i32>} : memref<36x256xf32, #tpu.memory_space<vmem>>, vector<4x256xf32>,
    %c0_59 = arith.constant 0 : index
    %c0_60 = arith.constant 0 : index
    %157 = vector.load %arg2[%c0_59, %c0_60] : memref<18x36xf32, #tpu.memory_space<vmem>>, vector<18x36xf32>
    %c0_61 = arith.constant 0 : index
    %c0_62 = arith.constant 0 : index
    %158 = vector.load %arg5[%c0_61, %c0_62] : memref<36x256xf32, #tpu.memory_space<vmem>>, vector<36x256xf32>
    %cst_63 = arith.constant dense<0.000000e+00> : vector<18x256xf32>
    %159 = tpu.matmul %157, %158, %cst_63 {dimension_numbers = #tpu.dot_dimension_numbers<[1], [0], [0], [1], [0, 0, 1, 1], [], []>} : vector<18x36xf32>, vector<36x256xf32>, vector<18x256xf32> -> vector<18x256xf32>
    %c0_64 = arith.constant 0 : index
    %c0_65 = arith.constant 0 : index
    %160 = vector.load %arg3[%c0_64, %c0_65] : memref<18x1xf32, #tpu.memory_space<vmem>>, vector<18x1xf32>
    %161 = vector.broadcast %160 : vector<18x1xf32> to vector<18x256xf32>
    %162 = arith.addf %159, %161 : vector<18x256xf32>
    %c0_66 = arith.constant 0 : index
    %c0_67 = arith.constant 0 : index
    %c0_68 = arith.constant 0 : index
    %163 = vector.load %arg4[%c0_66, %c0_67, %c0_68] : memref<1x18x256xf32, #tpu.memory_space<vmem>>, vector<1x18x256xf32>
    %164 = vector.shape_cast %163 : vector<1x18x256xf32> to vector<18x256xf32>
    %165 = vector.shape_cast %162 : vector<18x256xf32> to vector<1x18x256xf32>
    tpu.vector_store %arg4[%c0_66, %c0_67, %c0_68], %165 {strides = array<i32>} : memref<1x18x256xf32, #tpu.memory_space<vmem>>, vector<1x18x256xf32>,
    return
  }
  func.func @transform_0(%arg0: i32) -> (i32, i32, i32) {
    %c0_i32 = arith.constant 0 : i32
    %c0_i32_0 = arith.constant 0 : i32
    %c0_i32_1 = arith.constant 0 : i32
    return %arg0, %c0_i32, %c0_i32_0 : i32, i32, i32
  }
  func.func @transform_1(%arg0: i32) -> (i32, i32) {
    %c0_i32 = arith.constant 0 : i32
    %c0_i32_0 = arith.constant 0 : i32
    %c0_i32_1 = arith.constant 0 : i32
    return %c0_i32, %c0_i32_0 : i32, i32
  }
  func.func @transform_2(%arg0: i32) -> (i32, i32) {
    %c0_i32 = arith.constant 0 : i32
    %c0_i32_0 = arith.constant 0 : i32
    %c0_i32_1 = arith.constant 0 : i32
    return %c0_i32, %c0_i32_0 : i32, i32
  }
  func.func @transform_3(%arg0: i32) -> (i32, i32, i32) {
    %c0_i32 = arith.constant 0 : i32
    %c0_i32_0 = arith.constant 0 : i32
    %c0_i32_1 = arith.constant 0 : i32
    return %arg0, %c0_i32, %c0_i32_0 : i32, i32, i32
  }
}

module attributes {stable_mosaic.version = 11 : i64} {
  func.func @_gate_proj2_res_kernel(%arg0: i32, %arg1: i32, %arg2: memref<1x4x256xbf16, #tpu.memory_space<vmem>>, %arg3: memref<4x4xf32, #tpu.memory_space<vmem>>, %arg4: memref<4x1xf32, #tpu.memory_space<vmem>>, %arg5: memref<1x4x256xbf16, #tpu.memory_space<vmem>>, %arg6: memref<4x4xf32, #tpu.memory_space<vmem>>, %arg7: memref<4x1xf32, #tpu.memory_space<vmem>>, %arg8: memref<1x4x256xf32, #tpu.memory_space<vmem>>, %arg9: memref<1x4x256xf32, #tpu.memory_space<vmem>>) attributes {dimension_semantics = [#tpu.dimension_semantics<parallel>, #tpu.dimension_semantics<parallel>], iteration_bounds = array<i64: 2, 1>, scalar_prefetch = 0 : i64, scratch_operands = 0 : i64, tpu.core_type = #tpu.core_type<tc>, window_params = [{transform_indices = @transform_0, window_bounds = array<i64: 1, 4, 256>}, {pipeline_mode = #tpu.pipeline_mode<synchronous>, transform_indices = @transform_1, window_bounds = array<i64: 4, 4>}, {pipeline_mode = #tpu.pipeline_mode<synchronous>, transform_indices = @transform_2, window_bounds = array<i64: 4, 1>}, {transform_indices = @transform_3, window_bounds = array<i64: 1, 4, 256>}, {pipeline_mode = #tpu.pipeline_mode<synchronous>, transform_indices = @transform_4, window_bounds = array<i64: 4, 4>}, {pipeline_mode = #tpu.pipeline_mode<synchronous>, transform_indices = @transform_5, window_bounds = array<i64: 4, 1>}, {transform_indices = @transform_6, window_bounds = array<i64: 1, 4, 256>}, {transform_indices = @transform_7, window_bounds = array<i64: 1, 4, 256>}]} {
    %c0 = arith.constant 0 : index
    %c0_0 = arith.constant 0 : index
    %0 = vector.load %arg3[%c0, %c0_0] : memref<4x4xf32, #tpu.memory_space<vmem>>, vector<4x4xf32>
    %c0_1 = arith.constant 0 : index
    %c0_2 = arith.constant 0 : index
    %c0_3 = arith.constant 0 : index
    %1 = vector.load %arg2[%c0_1, %c0_2, %c0_3] : memref<1x4x256xbf16, #tpu.memory_space<vmem>>, vector<1x4x256xbf16>
    %2 = vector.shape_cast %1 : vector<1x4x256xbf16> to vector<4x256xbf16>
    %3 = arith.extf %2 : vector<4x256xbf16> to vector<4x256xf32>
    %cst = arith.constant dense<0.000000e+00> : vector<4x256xf32>
    %4 = tpu.matmul %0, %3, %cst {dimension_numbers = #tpu.dot_dimension_numbers<[1], [0], [0], [1], [0, 0, 1, 1], [], []>} : vector<4x4xf32>, vector<4x256xf32>, vector<4x256xf32> -> vector<4x256xf32>
    %c0_4 = arith.constant 0 : index
    %c0_5 = arith.constant 0 : index
    %5 = vector.load %arg4[%c0_4, %c0_5] : memref<4x1xf32, #tpu.memory_space<vmem>>, vector<4x1xf32>
    %6 = vector.broadcast %5 : vector<4x1xf32> to vector<4x256xf32>
    %7 = arith.addf %4, %6 : vector<4x256xf32>
    %c0_6 = arith.constant 0 : index
    %c0_7 = arith.constant 0 : index
    %c0_8 = arith.constant 0 : index
    %8 = vector.load %arg5[%c0_6, %c0_7, %c0_8] : memref<1x4x256xbf16, #tpu.memory_space<vmem>>, vector<1x4x256xbf16>
    %9 = vector.shape_cast %8 : vector<1x4x256xbf16> to vector<4x256xbf16>
    %10 = arith.extf %9 : vector<4x256xbf16> to vector<4x256xf32>
    %11 = arith.mulf %10, %7 : vector<4x256xf32>
    %c0_9 = arith.constant 0 : index
    %c0_10 = arith.constant 0 : index
    %12 = vector.load %arg6[%c0_9, %c0_10] : memref<4x4xf32, #tpu.memory_space<vmem>>, vector<4x4xf32>
    %cst_11 = arith.constant dense<0.000000e+00> : vector<4x256xf32>
    %13 = tpu.matmul %12, %11, %cst_11 {dimension_numbers = #tpu.dot_dimension_numbers<[1], [0], [0], [1], [0, 0, 1, 1], [], []>} : vector<4x4xf32>, vector<4x256xf32>, vector<4x256xf32> -> vector<4x256xf32>
    %c0_12 = arith.constant 0 : index
    %c0_13 = arith.constant 0 : index
    %14 = vector.load %arg7[%c0_12, %c0_13] : memref<4x1xf32, #tpu.memory_space<vmem>>, vector<4x1xf32>
    %15 = vector.broadcast %14 : vector<4x1xf32> to vector<4x256xf32>
    %16 = arith.addf %13, %15 : vector<4x256xf32>
    %c0_14 = arith.constant 0 : index
    %c0_15 = arith.constant 0 : index
    %c0_16 = arith.constant 0 : index
    %17 = vector.load %arg8[%c0_14, %c0_15, %c0_16] : memref<1x4x256xf32, #tpu.memory_space<vmem>>, vector<1x4x256xf32>
    %18 = vector.shape_cast %17 : vector<1x4x256xf32> to vector<4x256xf32>
    %19 = arith.addf %16, %18 : vector<4x256xf32>
    %c0_17 = arith.constant 0 : index
    %c0_18 = arith.constant 0 : index
    %c0_19 = arith.constant 0 : index
    %20 = vector.load %arg9[%c0_17, %c0_18, %c0_19] : memref<1x4x256xf32, #tpu.memory_space<vmem>>, vector<1x4x256xf32>
    %21 = vector.shape_cast %20 : vector<1x4x256xf32> to vector<4x256xf32>
    %22 = vector.shape_cast %19 : vector<4x256xf32> to vector<1x4x256xf32>
    tpu.vector_store %arg9[%c0_17, %c0_18, %c0_19], %22 {strides = array<i32>} : memref<1x4x256xf32, #tpu.memory_space<vmem>>, vector<1x4x256xf32>,
    return
  }
  func.func @transform_0(%arg0: i32, %arg1: i32) -> (i32, i32, i32) {
    %c0_i32 = arith.constant 0 : i32
    %c0_i32_0 = arith.constant 0 : i32
    return %arg0, %c0_i32, %arg1 : i32, i32, i32
  }
  func.func @transform_1(%arg0: i32, %arg1: i32) -> (i32, i32) {
    %c0_i32 = arith.constant 0 : i32
    %c0_i32_0 = arith.constant 0 : i32
    %c0_i32_1 = arith.constant 0 : i32
    return %c0_i32, %c0_i32_0 : i32, i32
  }
  func.func @transform_2(%arg0: i32, %arg1: i32) -> (i32, i32) {
    %c0_i32 = arith.constant 0 : i32
    %c0_i32_0 = arith.constant 0 : i32
    %c0_i32_1 = arith.constant 0 : i32
    return %c0_i32, %c0_i32_0 : i32, i32
  }
  func.func @transform_3(%arg0: i32, %arg1: i32) -> (i32, i32, i32) {
    %c0_i32 = arith.constant 0 : i32
    %c0_i32_0 = arith.constant 0 : i32
    return %arg0, %c0_i32, %arg1 : i32, i32, i32
  }
  func.func @transform_4(%arg0: i32, %arg1: i32) -> (i32, i32) {
    %c0_i32 = arith.constant 0 : i32
    %c0_i32_0 = arith.constant 0 : i32
    %c0_i32_1 = arith.constant 0 : i32
    return %c0_i32, %c0_i32_0 : i32, i32
  }
  func.func @transform_5(%arg0: i32, %arg1: i32) -> (i32, i32) {
    %c0_i32 = arith.constant 0 : i32
    %c0_i32_0 = arith.constant 0 : i32
    %c0_i32_1 = arith.constant 0 : i32
    return %c0_i32, %c0_i32_0 : i32, i32
  }
  func.func @transform_6(%arg0: i32, %arg1: i32) -> (i32, i32, i32) {
    %c0_i32 = arith.constant 0 : i32
    %c0_i32_0 = arith.constant 0 : i32
    return %arg0, %c0_i32, %arg1 : i32, i32, i32
  }
  func.func @transform_7(%arg0: i32, %arg1: i32) -> (i32, i32, i32) {
    %c0_i32 = arith.constant 0 : i32
    %c0_i32_0 = arith.constant 0 : i32
    return %arg0, %c0_i32, %arg1 : i32, i32, i32
  }
}

</mosaic_0001>

<bundles_post_ra>
// kernel: tile.23
= control target key start
LH: loop header
LB: loop body
LE: loop exit
PB: predicated region body
PF: predicated region fallthrough
CT: control target
= control target key end

     0   :  { %s28_s0 = inlined_call_operand.vmem [shape: f32[16], index: 0, kind: input, shape index: {}]   ;;  %s29_s1 = inlined_call_operand.vmem [shape: f32[16,16], index: 1, kind: output, shape index: {}]  }
   0x1   :  { %v4_v0 = vld [vmem:[%s28_s0] ss:$0 sm:$0xff] }
   0x2   :  { %5 = vst [vmem:[%s29_s1] sm:$0xff] %v4_v0  ;;  %8 = vst [vmem:[%s29_s1 + $0x8] sm:$0xff] %v4_v0 }

// kernel: tile.28
= control target key start
LH: loop header
LB: loop body
LE: loop exit
PB: predicated region body
PF: predicated region fallthrough
CT: control target
= control target key end

     0   :  { %s22_s0 = inlined_call_operand.vmem [shape: f32[3], index: 0, kind: input, shape index: {}]   ;;  %s23_s1 = inlined_call_operand.vmem [shape: f32[3,3], index: 1, kind: output, shape index: {}]  }
   0x1   :  { %v4_v0 = vld [vmem:[%s22_s0] ss:$0 sm:$0xff] }
   0x2   :  { %5 = vst [vmem:[%s23_s1] sm:$0xf] %v4_v0 }

// kernel: attention_forward.6
= control target key start
LH: loop header
LB: loop body
LE: loop exit
PB: predicated region body
PF: predicated region fallthrough
CT: control target
= control target key end

     0   :  { %8 = vsyncpa [#allocation3], 0  ;;  %s622_s12 = smov 0   ;;  %s624_s13 = smov 0   ;;  %s711_s0 = inlined_call_operand.vmem [shape: f32[2,4,256], index: 0, kind: input, shape index: {}]   ;;  %s712_s1 = inlined_call_operand.hbm [shape: f32[4,4], index: 1, kind: input, shape index: {}]   ;;  %s713_s2 = inlined_call_operand.vmem [shape: f32[4,1], index: 2, kind: input, shape index: {}]   ;;  %s714_s3 = inlined_call_operand.vmem [shape: bf16[2,4,256], index: 3, kind: output, shape index: {}]  }
   0x1   :  { %s626_s14 = smov 0  }
   0x2 LB: > { %s480_s15 = sadd.s32 4294967295, %s597_s14   ;;  %s26_s16 = sadd.s32 1, %s593_s13  ;;  %s597_s14 = sphi %s626_s14, %s14_s14   ;;  %s593_s13 = sphi %s624_s13, %s724_s13   ;;  %s589_s12 = sphi %s622_s12, %s723_s12  }
   0x3   : > { %p28_p0 = scmp.ge.s32.totalorder %s26_s16, 2  ;;  %p482_p1 = scmp.ge.s32.totalorder %s597_s14, 1 }
   0x4   : > { %p129_p2 = scmp.lt.s32.totalorder %s597_s14, 3  ;;  %p647_p4 = scmp.eq.s32.totalorder %s480_s15, 0 }
   0x5   : > { %s726_s16 = smov (%p28_p0, %s26_s16), 0  ;;  %s599_s19 = smov [#allocation2]  }
   0x6   : > { %p643_p3 = pnand %p482_p1, %p129_p2  ;;  %s142_s20 = sshll.u32 %s599_s19, 4  ;;  %s143_s20 = int_to_ptr.vmem [resolvable:$true] %s142_s20 }
   0x7   : > { %s719_s18 = scalar_select %p647_p4, 1, 0 }
   0x8   : > { %s718_s17 = scalar_select %p643_p3, 1, 0 }
   0x9   : > { %p504_p5 = pneg %p643_p3  ;;  %s543_s24 = scalar_lea.hbm %s712_s1, 64 }
   0xa   : > { %p544_p7 = scmp.ne.s32.totalorder %s712_s1, %s543_s24  ;;  %p550_p11 = scmp.lt.u32.totalorder %s543_s24, %s712_s1 }
   0xb   : > { %p655_p6 = pnand %p647_p4, %p504_p5 }
   0xd   : > { %p545_p8 = pneg %p655_p6 }
   0xf   : > { %p546_p9 = pnand %p545_p8, %p544_p7 }
  0x11   : > { %p547_p10 = pneg %p546_p9 }
  0x13   : > { %p552_p12 = pnand %p550_p11, %p547_p10 }
  0x15   : > { %555 = shalt.err (!%p552_p12)
}
  0x16   : > { %s556_s29 = scalar_lea.vmem %s143_s20, 64  ;;  %p564_p2 = scmp.lt.s32.totalorder %s143_s20, %s143_s20 }
  0x17   : > { %p557_p13 = scmp.ne.s32.totalorder %s143_s20, %s556_s29  ;;  %p565_p5 = scmp.lt.s32.totalorder %s556_s29, %s556_s29 }
  0x19   : > { %p559_p0 = pnand %p557_p13, %p545_p8  ;;  %p566_p4 = por %p565_p5, %p564_p2 }
  0x1b   : > { %p560_p1 = pneg %p559_p0 }
  0x1d   : > { %p567_p3 = pnand %p566_p4, %p560_p1 }
  0x1f   : > { %570 = shalt.err (!%p567_p3)
}
  0x20   : > { %507 = dma.hbm_to_vmem [thread:$0]  (!%p655_p6), %s712_s1, 64, %s143_s20, [#allocation3]  }
  0x21   : > { %p721_p7 = scmp.ne.s32.totalorder %s718_s17, 0 }
  0x22   : > { %p722_p9 = scmp.ne.s32.totalorder (!%p721_p7), %s719_s18, 0 }
  0x23   : > { %171 = sbr.rel (%p721_p7) target bundleno = 328 (0x148), region = 32 }
  0x2a   : > { %584 = dma.done.wait (%p722_p9), [#allocation3], 64  }
  0x2b   : > { %586 = vsyncadd (%p722_p9), [#allocation3], 4294967232  ;;  %p204_p8 = scmp.lt.s32.totalorder %s589_s12, 1  ;;  %v600_v0 = vmov 0.0   ;;  %v601_v1 = vmov 0   ;;  %vm227_vm0 = vcmask 1043456  }
  0x2c   : > { %360 = vmatprep.mubr.f32.mxu0 %v600_v0  ;;  %537 = vset.pattern.permute.xlu0 %v601_v1  ;;  %v280_v3 = vld [vmem:[%s713_s2] sm:$0xf]  ;;  %vm288_vm1 = vcmask 31744  }
  0x2d   : > { %s728_s12 = smov (!%p204_p8, %s589_s12), 1  ;;  %283 = vperm.xlu0 %537, %v280_v3   ;;  %v279_v48 = vld [vmem:[#allocation2] sm:$0xf] }
  0x2e   : > { %s498_s5 = sshll.u32 %s728_s12, 3  ;;  %s499_s11 = sshll.u32 %s728_s12, 2 }
  0x2f   : > { %s211_s8 = scalar_lea.vmem %s711_s0, %s498_s5  ;;  %s221_s18 = scalar_lea.vmem %s714_s3, %s499_s11 }
  0x30   : > { %v223_v2 = vld [vmem:[%s211_s8] sm:$0xff] }
  0x31   : > { %v225_v4 = vcombine.high %v223_v2, %v223_v2  ;;  %v228_v5 = vsel %vm227_vm0, %v223_v2, 0.0 }
  0x32   : > { %v229_v6 = vrot.slane %v228_v5, 4 }
  0x33   : > { %v235_v7 = vsel %vm227_vm0, %v225_v4, 0.0 }
  0x34   : > { %v230_v8 = vadd.f32 %v229_v6, %v228_v5  ;;  %v236_v9 = vrot.slane %v235_v7, 4 }
  0x36   : > { %v231_v10 = vrot.slane %v230_v8, 2  ;;  %v237_v11 = vadd.f32 %v236_v9, %v235_v7 }
  0x38   : > { %v232_v12 = vadd.f32 %v231_v10, %v230_v8  ;;  %v238_v13 = vrot.slane %v237_v11, 2 }
  0x3a   : > { %v233_v14 = vrot.slane %v232_v12, 1  ;;  %v239_v15 = vadd.f32 %v238_v13, %v237_v11 }
  0x3c   : > { %v234_v16 = vadd.f32 %v233_v14, %v232_v12  ;;  %v240_v17 = vrot.slane %v239_v15, 1 }
  0x3e   : > { %v241_v18 = vadd.f32 %v240_v17, %v239_v15  ;;  %v243_v19 = vmul.f32 0.25, %v234_v16 }
  0x40   : > { %v244_v20 = vmul.f32 0.25, %v241_v18 }
  0x42   : > { %v247_v21 = vcombine.low %v243_v19, %v244_v20 }
  0x44   : > { %v249_v22 = vsub.f32 %v223_v2, %v247_v21 }
  0x46   : > { %v250_v23 = vmul.f32 %v249_v22, %v249_v22 }
  0x48   : > { %v252_v24 = vcombine.high %v250_v23, %v250_v23  ;;  %v254_v25 = vsel %vm227_vm0, %v250_v23, 0.0 }
  0x49   : > { %v255_v26 = vrot.slane %v254_v25, 4 }
  0x4a   : > { %v261_v27 = vsel %vm227_vm0, %v252_v24, 0.0 }
  0x4b   : > { %v256_v28 = vadd.f32 %v255_v26, %v254_v25  ;;  %v262_v29 = vrot.slane %v261_v27, 4 }
  0x4d   : > { %v257_v30 = vrot.slane %v256_v28, 2  ;;  %v263_v31 = vadd.f32 %v262_v29, %v261_v27 }
  0x4f   : > { %v258_v32 = vadd.f32 %v257_v30, %v256_v28  ;;  %v264_v33 = vrot.slane %v263_v31, 2 }
  0x51   : > { %v259_v34 = vrot.slane %v258_v32, 1  ;;  %v265_v35 = vadd.f32 %v264_v33, %v263_v31 }
  0x53   : > { %v260_v36 = vadd.f32 %v259_v34, %v258_v32  ;;  %v266_v37 = vrot.slane %v265_v35, 1 }
  0x55   : > { %v267_v38 = vadd.f32 %v266_v37, %v265_v35  ;;  %v268_v39 = vmul.f32 0.25, %v260_v36 }
  0x57   : > { %v269_v40 = vmul.f32 0.25, %v267_v38  ;;  %v270_v41 = vadd.f32 1e-06, %v268_v39 }
  0x59   : > { %v271_v42 = vadd.f32 1e-06, %v269_v40  ;;  %539 = vrsqrt.f32 %v270_v41 }
  0x5b   : > { %541 = vrsqrt.f32 %v271_v42 }
  0x63   : > { %v540_v43 = vpop.eup %539 }
  0x65   : > { %v542_v44 = vpop.eup %541 }
  0x66   : > { %v276_v45 = vcombine.low %v540_v43, %v542_v44 }
  0x68   : > { %v278_v46 = vmul.f32 %v276_v45, %v249_v22 }
  0x6a   : > { %v287_v47 = vcombine.high %v278_v46, %v278_v46 }
  0x6c   : > { %491 = vmatprep.subr.msk.mxu0 %vm227_vm0, %v287_v47 }
  0x6d   : > { %492 = vmatpush1.msk.msra.mxu0 %vm227_vm0, %v278_v46 }
  0x6e   : > { %493 = vmatmul.mubr.msk.f32.vlgmr.msra.gmra.mrb[0].mxu0 %vm288_vm1, %v279_v48 }
  0xac   : > { %v284_v49 = vpop.permute.xlu0 %283 }
 0x141   : > { %v362_v50 = vpop.f32.mrb[0].mxu0 }
 0x142   : > { %v363_v51 = vadd.f32 %v362_v50, %v284_v49  ;;  %v364_v52 = vpop.f32.mrb[1].mxu0 }
 0x143   : > { %v365_v53 = vadd.f32 %v364_v52, %v284_v49 }
 0x145   : > { %v494_v54 = vpack.c.bf16 %v365_v53, %v363_v51 }
 0x147   : > { %495 = vst.sshfl [vmem:[%s221_s18] sm:$0x33 pattern:$0x76325410] %v494_v54 }
 0x148 PF: > { %s14_s14 = sadd.s32 1, %s597_s14   ;;  %s723_s12 = smov %s593_s13 }
 0x149   : > { %p11_p3 = scmp.ge.s32.totalorder %s14_s14, 4   ;;  %s724_s13 = smov %s726_s16 }
 0x14b   :  { %13 = sbr.rel (!%p11_p3) target bundleno = 2 (0x2), region = 67 }
 0x152   :  { %411 = vsyncpa [#allocation3], 1 }
 0x153   :  { %413 = vsyncpa [#allocation3 + $0x1], 1 }

// kernel: attention_forward.7
= control target key start
LH: loop header
LB: loop body
LE: loop exit
PB: predicated region body
PF: predicated region fallthrough
CT: control target
= control target key end

     0   :  { %8 = vsyncpa [#allocation4], 0  ;;  %s784_s12 = smov 0   ;;  %s907_s0 = inlined_call_operand.vmem [shape: bf16[2,4,256], index: 0, kind: input, shape index: {}]   ;;  %s908_s1 = inlined_call_operand.hbm [shape: f32[18,36], index: 1, kind: input, shape index: {}]   ;;  %s909_s2 = inlined_call_operand.vmem [shape: f32[18,1], index: 2, kind: input, shape index: {}]   ;;  %s910_s3 = inlined_call_operand.vmem [shape: f32[2,18,256], index: 3, kind: output, shape index: {}]  }
   0x1 LB: > { %s790_s13 = sadd.s32 4294967295, %s749_s12   ;;  %p607_p0 = scmp.ge.s32.totalorder %s749_s12, 1  ;;  %s749_s12 = sphi %s784_s12, %s14_s12  }
   0x2   : > { %p113_p1 = scmp.lt.s32.totalorder %s749_s12, 3  ;;  %s751_s14 = smov [#allocation3]  }
   0x3   : > { %s125_s15 = sshll.u32 %s751_s14, 4  ;;  %p911_p3 = scmp.eq.s32.totalorder %s790_s13, 0  ;;  %s126_s15 = int_to_ptr.vmem [resolvable:$true] %s125_s15 }
   0x4   : > { %p794_p2 = pnand %p607_p0, %p113_p1  ;;  %s711_s20 = scalar_lea.hbm %s908_s1, 384 }
   0x5   : > { %p712_p6 = scmp.ne.s32.totalorder %s908_s1, %s711_s20  ;;  %p718_p10 = scmp.lt.u32.totalorder %s711_s20, %s908_s1 }
   0x6   : > { %s913_s16 = scalar_select %p794_p2, 1, 0 }
   0x7   : > { %p642_p4 = pneg %p794_p2 }
   0x9   : > { %p803_p5 = pnand %p911_p3, %p642_p4 }
   0xb   : > { %p713_p7 = pneg %p803_p5 }
   0xd   : > { %p714_p8 = pnand %p713_p7, %p712_p6 }
   0xf   : > { %p715_p9 = pneg %p714_p8 }
  0x11   : > { %p720_p11 = pnand %p718_p10, %p715_p9 }
  0x13   : > { %723 = shalt.err (!%p720_p11)
}
  0x14   : > { %s724_s25 = scalar_lea.vmem %s126_s15, 384  ;;  %p732_p1 = scmp.lt.s32.totalorder %s126_s15, %s126_s15 }
  0x15   : > { %p725_p12 = scmp.ne.s32.totalorder %s126_s15, %s724_s25  ;;  %p733_p4 = scmp.lt.s32.totalorder %s724_s25, %s724_s25 }
  0x17   : > { %p727_p13 = pnand %p725_p12, %p713_p7  ;;  %p734_p3 = por %p733_p4, %p732_p1 }
  0x19   : > { %p728_p0 = pneg %p727_p13 }
  0x1b   : > { %p735_p2 = pnand %p734_p3, %p728_p0 }
  0x1d   : > { %738 = shalt.err (!%p735_p2)
}
  0x1e   : > { %s752_s26 = smov 128   ;;  %s753_s27 = smov 8  }
  0x1f   : > { %645 = dma.hbm_to_vmem [thread:$0]  (!%p803_p5), %s908_s1, 384, %s126_s15, [#allocation4], %s752_s26, %s752_s26, %s753_s27  }
  0x20   : > { %p915_p6 = scmp.ne.s32.totalorder %s913_s16, 0 }
  0x21   : > { %p916_p8 = scmp.eq.s32.totalorder (!%p915_p6), %s790_s13, 0 }
  0x22   : > { %152 = sbr.rel (%p915_p6) target bundleno = 424 (0x1a8), region = 32 }
  0x29   : > { %744 = dma.done.wait (%p916_p8), [#allocation4], 384   ;;  %p917_p7 = pmov %p916_p8 }
  0x2a   : > { %v754_v0 = vmov 0.0   ;;  %s755_s30 = smov 16   ;;  %s756_s4 = smov 1   ;;  %v415_v6 = vld [vmem:[%s909_s2 + $0x8] sm:$0xff]  ;;  %v414_v7 = vld [vmem:[%s909_s2] sm:$0xff]  ;;  %v763_v8 = vmov 0   ;;  %v191_v10 = vlaneseq }
  0x2b   : > { %746 = vsyncadd (%p917_p7), [#allocation4], 4294966912  ;;  %256 = vrot.lane.b32.xlu0 %v754_v0, %s755_s30  ;;  %304 = vrot.lane.b32.xlu1 %v754_v0, %s756_s4  ;;  %p176_p2 = scmp.lt.s32.totalorder %s790_s13, 1  ;;  %s757_s5 = smov 17   ;;  %v416_v9 = vld [vmem:[%s909_s2 + $0x10] sm:$0x3] }
  0x2c   : > { %519 = vmatprep.mubr.f32.mxu1 %v754_v0  ;;  %513 = vmatprep.mubr.f32.mxu0 %v754_v0  ;;  %s758_s6 = smov 15   ;;  %s759_s11 = smov 127   ;;  %v192_v11 = vand.u32 127, %v191_v10  ;;  %vm237_vm1 = vcmask 138240   ;;  %vm310_vm2 = vcmask 7168   ;;  %vm295_vm6 = vcmask 121856  }
  0x2d   : > { %s919_s13 = smov (!%p176_p2, %s790_s13), 1  ;;  %s760_s14 = smov 113   ;;  %710 = vset.pattern.permute.xlu1 %v763_v8  ;;  %709 = vset.pattern.permute.xlu0 %v763_v8  ;;  %vm262_vm7 = vcmask 130048   ;;  %vm335_vm8 = vcmask 1039360   ;;  %vm356_vm9 = vcmask 924672   ;;  %vm371_vm10 = vcmask 916480  }
  0x2e   : > { %s622_s7 = sshll.u32 %s919_s13, 2  ;;  %s761_s15 = smov 112   ;;  %v193_v14 = vadd.s32 128, %v192_v11  ;;  %v198_v16 = vand.u32 15, %v192_v11  ;;  %vm392_vm11 = vcmask 908288   ;;  %vm442_vm12 = vcmask 1043456  }
  0x2f   : > { %231 = vrot.lane.b32.xlu0 %v754_v0, %s757_s5  ;;  %289 = vrot.lane.b32.xlu1 %v754_v0, %s758_s6  ;;  %s180_s10 = scalar_lea.vmem %s907_s0, %s622_s7  ;;  %s762_s16 = smov 111   ;;  %vm432_vm13 = vcmask 293888  }
  0x30   : > { %v186_v1 = vld [vmem:[%s180_s10] sm:$0xf]  ;;  %v205_v15 = vand.u32 15, %v193_v14  ;;  %v855_v20 = vadd.s32 4294967295, %v198_v16  ;;  %v857_v21 = vadd.s32 1, %v198_v16  ;;  %s637_s23 = smul.u32 48, %s919_s13 }
  0x31   : > { %v187_v2 = vunpack.c.l.bf16 %v186_v1 }
  0x32   : > { %v853_v19 = vadd.s32 4294967295, %v205_v15  ;;  %v859_v22 = vadd.s32 1, %v205_v15  ;;  %vm220_vm3 = vcmp.ge.s32.totalorder %v855_v20, 0  ;;  %vm281_vm4 = vcmp.lt.s32.totalorder %v857_v21, 16  ;;  %s185_s26 = scalar_lea.vmem %s910_s3, %s637_s23 }
  0x33   : > { %v189_v3 = vcombine.high %v187_v2, %v187_v2  ;;  %327 = vst [vmem:[#allocation2 + $0x20] sm:$0xf] %v187_v2 }
  0x34   : > { %vm221_vm0 = vcmp.ge.s32.totalorder %v853_v19, 0  ;;  %vm282_vm5 = vcmp.lt.s32.totalorder %v859_v22, 16  ;;  %v401_v22 = vld [vmem:[#allocation3] sm:$0xff] }
  0x35   : > { %v679_v4 = vpack.i.bf16 %v189_v3, %v187_v2  ;;  %328 = vst [vmem:[#allocation2 + $0x28] sm:$0xf] %v189_v3  ;;  %v689_v5 = vpack.i.bf16 %v754_v0, %v189_v3 }
  0x37   : > { %680 = vrot.lane.b32.xlu1 %v679_v4, %s757_s5  ;;  %670 = vrot.lane.b32.xlu0 %v679_v4, %s756_s4 }
  0x3b   : > { %685 = vrot.lane.b32.xlu1 %v679_v4, %s758_s6  ;;  %675 = vrot.lane.b32.xlu0 %v679_v4, %s755_s30 }
  0x3f   : > { %329 = vrot.lane.b32.xlu1 %v187_v2, %s759_s11  ;;  %690 = vrot.lane.b32.xlu0 %v689_v5, %s759_s11 }
  0x43   : > { %700 = vrot.lane.b32.xlu1 %v689_v5, %s760_s14  ;;  %695 = vrot.lane.b32.xlu0 %v689_v5, %s761_s15 }
  0x47   : > { %350 = vrot.lane.b32.xlu1 %v187_v2, %s760_s14  ;;  %365 = vrot.lane.b32.xlu0 %v187_v2, %s761_s15 }
  0x4b   : > { %705 = vrot.lane.b32.xlu0 %v689_v5, %s762_s16  ;;  %386 = vrot.lane.b32.xlu1 %v187_v2, %s762_s16 }
  0x4f   : > { %424 = vperm.xlu1 %710, %v415_v6   ;;  %419 = vperm.xlu0 %709, %v414_v7  }
  0x53   : > { %429 = vperm.xlu1 %710, %v416_v9  }
  0x9d   : > { %v257_v12 = vpop.permute.xlu0 %256  ;;  %v305_v13 = vpop.permute.xlu1 %304 }
  0xa1   : > { %v232_v17 = vpop.permute.xlu0 %231  ;;  %v290_v18 = vpop.permute.xlu1 %289 }
  0xa9   : > { %v681_v23 = vpop.permute.xlu1 %680  ;;  %v671_v24 = vpop.permute.xlu0 %670 }
  0xaa   : > { %v683_v25 = vunpack.i.h.bf16 %v681_v23  ;;  %v682_v26 = vunpack.i.l.bf16 %v681_v23  ;;  %v673_v27 = vunpack.i.h.bf16 %v671_v24  ;;  %v672_v28 = vunpack.i.l.bf16 %v671_v24 }
  0xac   : > { %v238_v29 = vsel %vm237_vm1, %v232_v17, %v682_v26  ;;  %v239_v30 = vsel %vm237_vm1, %v682_v26, %v683_v25  ;;  %v311_v31 = vsel %vm310_vm2, %v305_v13, %v672_v28  ;;  %v312_v32 = vsel %vm310_vm2, %v672_v28, %v673_v27 }
  0xad   : > { %v243_v33 = vsel %vm221_vm0, %v239_v30, 0.0  ;;  %v316_v34 = vsel %vm221_vm0, %v312_v32, 0.0  ;;  %v686_v35 = vpop.permute.xlu1 %685  ;;  %v676_v36 = vpop.permute.xlu0 %675  ;;  %v242_v37 = vsel %vm220_vm3, %v238_v29, 0.0  ;;  %v315_v38 = vsel %vm220_vm3, %v311_v31, 0.0 }
  0xae   : > { %245 = vst [vmem:[#allocation2 + $0x8] sm:$0xf] %v243_v33  ;;  %v320_v39 = vrot.slane %v316_v34, 4  ;;  %v688_v40 = vunpack.i.h.bf16 %v686_v35  ;;  %v687_v41 = vunpack.i.l.bf16 %v686_v35  ;;  %v678_v42 = vunpack.i.h.bf16 %v676_v36  ;;  %244 = vst [vmem:[#allocation2] sm:$0xf] %v242_v37 }
  0xaf   : > { %v677_v43 = vunpack.i.l.bf16 %v676_v36  ;;  %v319_v44 = vrot.slane %v315_v38, 4  ;;  %v402_v38 = vld [vmem:[#allocation3 + $0x8] sm:$0xff] }
  0xb0   : > { %324 = vst [vmem:[#allocation2 + $0x18] sm:$0xf0] %v320_v39  ;;  %v296_v45 = vsel %vm295_vm6, %v290_v18, %v687_v41  ;;  %v297_v46 = vsel %vm295_vm6, %v687_v41, %v688_v40  ;;  %v403_v40 = vld [vmem:[#allocation3 + $0x10] sm:$0x3] }
  0xb1   : > { %v300_v47 = vsel %vm281_vm4, %v296_v45, 0.0  ;;  %v301_v48 = vsel %vm282_vm5, %v297_v46, 0.0  ;;  %v263_v49 = vsel %vm262_vm7, %v257_v12, %v677_v43  ;;  %v264_v50 = vsel %vm262_vm7, %v677_v43, %v678_v42  ;;  %v330_v51 = vpop.permute.xlu1 %329  ;;  %v691_v52 = vpop.permute.xlu0 %690  ;;  %323 = vst [vmem:[#allocation2 + $0x10] sm:$0xf0] %v319_v44 }
  0xb2   : > { %302 = vst [vmem:[#allocation2 + $0x10] sm:$0xf] %v300_v47  ;;  %303 = vst [vmem:[#allocation2 + $0x18] sm:$0xf] %v301_v48  ;;  %v271_v53 = vrot.slane %v263_v49, 4  ;;  %v272_v54 = vrot.slane %v264_v50, 4  ;;  %v693_v55 = vunpack.i.h.bf16 %v691_v52  ;;  %v692_v56 = vunpack.i.l.bf16 %v691_v52 }
  0xb4   : > { %275 = vst [vmem:[#allocation2] sm:$0xf0] %v271_v53  ;;  %276 = vst [vmem:[#allocation2 + $0x8] sm:$0xf0] %v272_v54  ;;  %v336_v57 = vsel %vm335_vm8, %v330_v51, %v692_v56  ;;  %v337_v58 = vsel %vm335_vm8, %v692_v56, %v693_v55 }
  0xb5   : > { %v340_v59 = vsel %vm281_vm4, %v336_v57, 0.0  ;;  %v341_v60 = vsel %vm282_vm5, %v337_v58, 0.0  ;;  %v701_v61 = vpop.permute.xlu1 %700  ;;  %v696_v62 = vpop.permute.xlu0 %695 }
  0xb6   : > { %v344_v63 = vrot.slane %v340_v59, 4  ;;  %v345_v1 = vrot.slane %v341_v60, 4  ;;  %v703_v2 = vunpack.i.h.bf16 %v701_v61  ;;  %v702_v3 = vunpack.i.l.bf16 %v701_v61 }
  0xb7   : > { %v698_v4 = vunpack.i.h.bf16 %v696_v62  ;;  %v697_v5 = vunpack.i.l.bf16 %v696_v62 }
  0xb8   : > { %348 = vst [vmem:[#allocation2 + $0x20] sm:$0xf0] %v344_v63  ;;  %349 = vst [vmem:[#allocation2 + $0x28] sm:$0xf0] %v345_v1  ;;  %v358_v6 = vsel %vm356_vm9, %v702_v3, %v703_v2 }
  0xb9   : > { %v351_v7 = vpop.permute.xlu1 %350  ;;  %v362_v8 = vsel %vm221_vm0, %v358_v6, 0.0  ;;  %v366_v9 = vpop.permute.xlu0 %365  ;;  %v373_v10 = vsel %vm371_vm10, %v697_v5, %v698_v4  ;;  %v407_v11 = vld [vmem:[#allocation2 + $0x18] sm:$0xff]  ;;  %v406_v12 = vld [vmem:[#allocation2 + $0x10] sm:$0xff] }
  0xba   : > { %v357_v13 = vsel %vm356_vm9, %v351_v7, %v702_v3  ;;  %364 = vst [vmem:[#allocation2 + $0x38] sm:$0xf] %v362_v8  ;;  %v372_v14 = vsel %vm371_vm10, %v366_v9, %v697_v5  ;;  %v381_v15 = vrot.slane %v373_v10, 4 }
  0xbb   : > { %v361_v16 = vsel %vm220_vm3, %v357_v13, 0.0  ;;  %v380_v17 = vrot.slane %v372_v14, 4  ;;  %v405_v18 = vld [vmem:[#allocation2 + $0x8] sm:$0xff]  ;;  %v404_v23 = vld [vmem:[#allocation2] sm:$0xff] }
  0xbc   : > { %363 = vst [vmem:[#allocation2 + $0x30] sm:$0xf] %v361_v16  ;;  %385 = vst [vmem:[#allocation2 + $0x38] sm:$0xf0] %v381_v15  ;;  %v623_v19 = vpack.c.bf16 %v407_v11, %v405_v18  ;;  %v625_v24 = vpack.c.bf16 %v406_v12, %v404_v23 }
  0xbd   : > { %384 = vst [vmem:[#allocation2 + $0x30] sm:$0xf0] %v380_v17  ;;  %v706_v25 = vpop.permute.xlu0 %705  ;;  %v387_v26 = vpop.permute.xlu1 %386 }
  0xbe   : > { %v708_v27 = vunpack.i.h.bf16 %v706_v25  ;;  %v707_v28 = vunpack.i.l.bf16 %v706_v25  ;;  %624 = vmatprep.subr.bf16.mxu0 %v623_v19  ;;  %631 = vmatprep.subr.bf16.mxu1 %v623_v19 }
  0xbf   : > { %626 = vmatpush1.bf16.msra.mxu0 %v625_v24  ;;  %634 = vmatpush1.bf16.msra.mxu1 %v625_v24  ;;  %v409_v32 = vld [vmem:[#allocation2 + $0x28] sm:$0xff]  ;;  %v408_v35 = vld [vmem:[#allocation2 + $0x20] sm:$0xff] }
  0xc0   : > { %v393_v29 = vsel %vm392_vm11, %v387_v26, %v707_v28  ;;  %v394_v20 = vsel %vm392_vm11, %v707_v28, %v708_v27 }
  0xc1   : > { %v397_v30 = vsel %vm281_vm4, %v393_v29, 0.0  ;;  %v398_v31 = vsel %vm282_vm5, %v394_v20, 0.0 }
  0xc2   : > { %399 = vst [vmem:[#allocation2 + $0x40] sm:$0xf] %v397_v30  ;;  %400 = vst [vmem:[#allocation2 + $0x48] sm:$0xf] %v398_v31 }
  0xc3   : > { %v411_v33 = vld [vmem:[#allocation2 + $0x38] sm:$0xff] }
  0xc4   : > { %v627_v34 = vpack.c.bf16 %v411_v33, %v409_v32  ;;  %v410_v36 = vld [vmem:[#allocation2 + $0x30] sm:$0xff] }
  0xc5   : > { %v629_v37 = vpack.c.bf16 %v410_v36, %v408_v35 }
  0xc6   : > { %628 = vmatprep.subr.bf16.mxu0 %v627_v34  ;;  %632 = vmatprep.subr.bf16.mxu1 %v627_v34 }
  0xc7   : > { %630 = vmatpush1.bf16.msra.mxu0 %v629_v37  ;;  %635 = vmatpush1.bf16.msra.mxu1 %v629_v37 }
  0xc9   : > { %v413_v21 = vld [vmem:[#allocation2 + $0x48] sm:$0xf]  ;;  %v412_v39 = vld [vmem:[#allocation2 + $0x40] sm:$0xf] }
  0xca   : > { %615 = vmatprep.subr.msk.mxu0 %vm442_vm12, %v413_v21  ;;  %633 = vmatprep.subr.msk.mxu1 %vm442_vm12, %v413_v21 }
  0xcb   : > { %616 = vmatpush1.msk.msra.mxu0 %vm442_vm12, %v412_v39  ;;  %636 = vmatpush1.msk.msra.mxu1 %vm442_vm12, %v412_v39 }
  0xcc   : > { %618 = vmatmul.mubr.msk.f32.vlgmr.msra.gmra.mrb[0].mxu1 %vm432_vm13, %v402_v38  ;;  %617 = vmatmul.mubr.msk.f32.vlgmr.msra.gmra.mrb[0].mxu0 %vm432_vm13, %v401_v22 }
  0xcd   : > { %525 = vmatprep.mubr.f32.mxu1 %v754_v0 }
  0xce   : > { %v425_v41 = vpop.permute.xlu1 %424  ;;  %v420_v42 = vpop.permute.xlu0 %419 }
  0xd0   : > { %619 = vmatmul.mubr.msk.f32.gmra.mrb[2].mxu1 %vm432_vm13, %v403_v40 }
  0xd2   : > { %v430_v0 = vpop.permute.xlu1 %429 }
 0x19f   : > { %v521_v43 = vpop.f32.mrb[0].mxu1  ;;  %v515_v44 = vpop.f32.mrb[0].mxu0 }
 0x1a0   : > { %v522_v45 = vadd.f32 %v521_v43, %v425_v41  ;;  %v523_v46 = vpop.f32.mrb[1].mxu1  ;;  %v516_v47 = vadd.f32 %v515_v44, %v420_v42  ;;  %v517_v48 = vpop.f32.mrb[1].mxu0 }
 0x1a1   : > { %v524_v49 = vadd.f32 %v523_v46, %v425_v41  ;;  %v518_v50 = vadd.f32 %v517_v48, %v420_v42 }
 0x1a2   : > { %534 = vst [vmem:[%s185_s26 + $0x10] sm:$0xff] %v522_v45  ;;  %532 = vst [vmem:[%s185_s26] sm:$0xff] %v516_v47 }
 0x1a3   : > { %535 = vst [vmem:[%s185_s26 + $0x18] sm:$0xff] %v524_v49  ;;  %533 = vst [vmem:[%s185_s26 + $0x8] sm:$0xff] %v518_v50  ;;  %v527_v51 = vpop.f32.mrb[2].mxu1 }
 0x1a4   : > { %v528_v52 = vadd.f32 %v527_v51, %v430_v0  ;;  %v529_v53 = vpop.f32.mrb[3].mxu1 }
 0x1a5   : > { %v530_v54 = vadd.f32 %v529_v53, %v430_v0 }
 0x1a6   : > { %536 = vst [vmem:[%s185_s26 + $0x20] sm:$0x3] %v528_v52 }
 0x1a7   : > { %537 = vst [vmem:[%s185_s26 + $0x28] sm:$0x3] %v530_v54 }
 0x1a8 PF: > { %s14_s12 = sadd.s32 1, %s749_s12  }
 0x1a9   : > { %p11_p3 = scmp.ge.s32.totalorder %s14_s12, 4  }
 0x1ab   :  { %13 = sbr.rel (!%p11_p3) target bundleno = 1 (0x1), region = 67 }
 0x1b2   :  { %559 = vsyncpa [#allocation4], 1 }
 0x1b3   :  { %561 = vsyncpa [#allocation4 + $0x1], 1 }

// kernel: attention_forward.8
= control target key start
LH: loop header
LB: loop body
LE: loop exit
PB: predicated region body
PF: predicated region fallthrough
CT: control target
= control target key end

     0   :  { %s482_s9 = smov 0   ;;  %s484_s10 = smov 0   ;;  %s518_s0 = inlined_call_operand.vmem [shape: bf16[2,36,256], index: 0, kind: input, shape index: {}]   ;;  %s519_s1 = inlined_call_operand.vmem [shape: f32[4,36], index: 1, kind: input, shape index: {}]   ;;  %s520_s2 = inlined_call_operand.vmem [shape: bf16[2,4,256], index: 2, kind: output, shape index: {}]  }
   0x1   :  { %s486_s11 = smov 0  }
   0x2 LB: > { %s24_s12 = sadd.s32 1, %s460_s10  ;;  %p386_p0 = scmp.ge.s32.totalorder %s464_s11, 1  ;;  %s464_s11 = sphi %s486_s11, %s12_s11   ;;  %s460_s10 = sphi %s484_s10, %s522_s10   ;;  %s456_s9 = sphi %s482_s9, %s521_s9  }
   0x3   : > { %p26_p1 = scmp.ge.s32.totalorder %s24_s12, 2  ;;  %p133_p2 = scmp.lt.s32.totalorder %s464_s11, 3 }
   0x5   : > { %s524_s12 = smov (%p26_p1, %s24_s12), 0  ;;  %p134_p3 = pnand %p386_p0, %p133_p2 }
   0x6   : > { %p164_p4 = scmp.lt.s32.totalorder (!%p134_p3), %s456_s9, 1  ;;  %v466_v0 = vmov (!%p134_p3), 0.0   ;;  %vm203_vm0 = vcmask (!%p134_p3), 1043456   ;;  %v183_v8 = vld [vmem:[%s519_s1] sm:$0xf] (!%p134_p3)  ;;  %vm199_vm1 = vcmask (!%p134_p3), 293888  }
   0x7   : > { %137 = sbr.rel (%p134_p3) target bundleno = 245 (0xf5), region = 28  ;;  %274 = vmatprep.mubr.f32.mxu0 (!%p134_p3), %v466_v0 }
   0xe   : > { %s526_s9 = smov (!%p164_p4, %s456_s9), 1 }
   0xf   : > { %s410_s13 = smul.u32 40, %s526_s9  ;;  %s397_s19 = sshll.u32 %s526_s9, 2 }
  0x10   : > { %s181_s22 = scalar_lea.vmem %s520_s2, %s397_s19 }
  0x11   : > { %s171_s16 = scalar_lea.vmem %s518_s0, %s410_s13 }
  0x12   : > { %v436_v1 = vld [vmem:[%s171_s16 + $0x4] ss:$8 sps:$4 sm:$0xff]   ;;  %v438_v2 = vld [vmem:[%s171_s16] ss:$8 sps:$4 sm:$0xff]   ;;  %v439_v3 = vld [vmem:[%s171_s16 + $0x14] ss:$8 sps:$4 sm:$0xff]  }
  0x13   : > { %399 = vmatprep.subr.bf16.mxu0 %v436_v1  ;;  %v188_v4 = vld [vmem:[%s171_s16 + $0x20] sm:$0x33]  ;;  %v441_v5 = vld [vmem:[%s171_s16 + $0x10] ss:$8 sps:$4 sm:$0xff]  }
  0x14   : > { %401 = vmatpush1.bf16.msra.mxu0 %v438_v2  ;;  %v198_v6 = vunpack.c.h.bf16 %v188_v4  ;;  %v197_v7 = vunpack.c.l.bf16 %v188_v4 }
  0x15   : > { %403 = vmatprep.subr.bf16.mxu0 %v439_v3 }
  0x18   : > { %405 = vmatpush1.bf16.msra.mxu0 %v441_v5 }
  0x19   : > { %390 = vmatprep.subr.msk.mxu0 %vm203_vm0, %v198_v6 }
  0x1c   : > { %391 = vmatpush1.msk.msra.mxu0 %vm203_vm0, %v197_v7 }
  0x1d   : > { %392 = vmatmul.mubr.msk.f32.vlgmr.msra.gmra.mrb[0].mxu0 %vm199_vm1, %v183_v8 }
  0xf0   : > { %v276_v9 = vpop.f32.mrb[0].mxu0 }
  0xf1   : > { %v278_v10 = vpop.f32.mrb[1].mxu0 }
  0xf2   : > { %v393_v11 = vpack.c.bf16 %v278_v10, %v276_v9 }
  0xf4   : > { %394 = vst.sshfl [vmem:[%s181_s22] sm:$0x33 pattern:$0x76325410] %v393_v11 }
  0xf5 PF: > { %s12_s11 = sadd.s32 1, %s464_s11   ;;  %s521_s9 = smov %s460_s10 }
  0xf6   : > { %p9_p5 = scmp.ge.s32.totalorder %s12_s11, 4   ;;  %s522_s10 = smov %s524_s12 }
  0xf8   :  { %11 = sbr.rel (!%p9_p5) target bundleno = 2 (0x2), region = 58 }

// kernel: attention_forward.9
= control target key start
LH: loop header
LB: loop body
LE: loop exit
PB: predicated region body
PF: predicated region fallthrough
CT: control target
= control target key end

     0   :  { %s707_s12 = smov 0   ;;  %s800_s0 = inlined_call_operand.vmem [shape: bf16[2,4,256], index: 0, kind: input, shape index: {}]   ;;  %s801_s1 = inlined_call_operand.vmem [shape: f32[18,36], index: 1, kind: input, shape index: {}]   ;;  %s802_s2 = inlined_call_operand.vmem [shape: f32[18,1], index: 2, kind: input, shape index: {}]   ;;  %s803_s3 = inlined_call_operand.vmem [shape: f32[2,18,256], index: 3, kind: output, shape index: {}]  }
   0x1 LB: > { %s578_s13 = sadd.s32 4294967295, %s675_s12   ;;  %p582_p0 = scmp.ge.s32.totalorder %s675_s12, 1  ;;  %s675_s12 = sphi %s707_s12, %s13_s12  }
   0x2   : > { %p137_p1 = scmp.lt.s32.totalorder %s675_s12, 3 }
   0x4   : > { %p138_p2 = pnand %p582_p0, %p137_p1 }
   0x5   : > { %v677_v0 = vmov (!%p138_p2), 0.0   ;;  %s678_s14 = smov (!%p138_p2), 16   ;;  %s679_s15 = smov (!%p138_p2), 1   ;;  %v400_v6 = vld [vmem:[%s802_s2 + $0x8] sm:$0xff] (!%p138_p2)  ;;  %v399_v7 = vld [vmem:[%s802_s2] sm:$0xff] (!%p138_p2)  ;;  %v686_v8 = vmov (!%p138_p2), 0   ;;  %v176_v10 = vlaneseq (!%p138_p2) }
   0x6   : > { %141 = sbr.rel (%p138_p2) target bundleno = 396 (0x18c), region = 32  ;;  %241 = vrot.lane.b32.xlu0 (!%p138_p2), %v677_v0, %s678_s14  ;;  %289 = vrot.lane.b32.xlu1 (!%p138_p2), %v677_v0, %s679_s15  ;;  %p161_p3 = scmp.lt.s32.totalorder (!%p138_p2), %s578_s13, 1  ;;  %v401_v9 = vld [vmem:[%s802_s2 + $0x10] sm:$0x3] (!%p138_p2)  ;;  %vm295_vm0 = vcmask (!%p138_p2), 7168   ;;  %vm222_vm3 = vcmask (!%p138_p2), 138240  }
   0x7   : > { %504 = vmatprep.mubr.f32.mxu1 (!%p138_p2), %v677_v0  ;;  %498 = vmatprep.mubr.f32.mxu0 (!%p138_p2), %v677_v0  ;;  %s680_s20 = smov (!%p138_p2), 17   ;;  %s681_s21 = smov (!%p138_p2), 15   ;;  %v177_v11 = vand.u32 (!%p138_p2), 127, %v176_v10  ;;  %vm247_vm4 = vcmask (!%p138_p2), 130048   ;;  %vm280_vm5 = vcmask (!%p138_p2), 121856   ;;  %vm320_vm8 = vcmask (!%p138_p2), 1039360  }
   0x8   : > { %s682_s22 = smov (!%p138_p2), 127   ;;  %s683_s23 = smov (!%p138_p2), 113   ;;  %668 = vset.pattern.permute.xlu1 (!%p138_p2), %v686_v8  ;;  %667 = vset.pattern.permute.xlu0 (!%p138_p2), %v686_v8  ;;  %vm341_vm9 = vcmask (!%p138_p2), 924672   ;;  %vm356_vm10 = vcmask (!%p138_p2), 916480   ;;  %vm377_vm11 = vcmask (!%p138_p2), 908288   ;;  %vm427_vm12 = vcmask (!%p138_p2), 1043456  }
   0x9   : > { %s684_s24 = smov (!%p138_p2), 112   ;;  %s685_s25 = smov (!%p138_p2), 111   ;;  %v178_v12 = vadd.s32 (!%p138_p2), 128, %v177_v11  ;;  %v183_v14 = vand.u32 (!%p138_p2), 15, %v177_v11  ;;  %vm417_vm13 = vcmask (!%p138_p2), 293888  }
   0xb   : > { %v190_v13 = vand.u32 (!%p138_p2), 15, %v178_v12  ;;  %v739_v18 = vadd.s32 (!%p138_p2), 4294967295, %v183_v14  ;;  %v745_v28 = vadd.s32 (!%p138_p2), 1, %v183_v14 }
   0xd   : > { %s805_s13 = smov (!%p161_p3, %s578_s13), 1  ;;  %v737_v17 = vadd.s32 4294967295, %v190_v13  ;;  %v742_v21 = vadd.s32 1, %v190_v13  ;;  %vm205_vm2 = vcmp.ge.s32.totalorder %v739_v18, 0  ;;  %vm266_vm7 = vcmp.lt.s32.totalorder %v745_v28, 16  ;;  %v387_v28 = vld [vmem:[%s801_s1 + $0x8] sm:$0xff] }
   0xe   : > { %s593_s16 = sshll.u32 %s805_s13, 2  ;;  %s608_s11 = smul.u32 48, %s805_s13 }
   0xf   : > { %s165_s19 = scalar_lea.vmem %s800_s0, %s593_s16  ;;  %vm206_vm1 = vcmp.ge.s32.totalorder %v737_v17, 0  ;;  %vm267_vm6 = vcmp.lt.s32.totalorder %v742_v21, 16 }
  0x10   : > { %v171_v1 = vld [vmem:[%s165_s19] sm:$0xf]  ;;  %s170_s16 = scalar_lea.vmem %s803_s3, %s608_s11 }
  0x11   : > { %v172_v2 = vunpack.c.l.bf16 %v171_v1 }
  0x13   : > { %v174_v3 = vcombine.high %v172_v2, %v172_v2  ;;  %312 = vst [vmem:[#allocation2 + $0x20] sm:$0xf] %v172_v2 }
  0x15   : > { %v637_v4 = vpack.i.bf16 %v174_v3, %v172_v2  ;;  %313 = vst [vmem:[#allocation2 + $0x28] sm:$0xf] %v174_v3  ;;  %v647_v5 = vpack.i.bf16 %v677_v0, %v174_v3 }
  0x17   : > { %638 = vrot.lane.b32.xlu1 %v637_v4, %s680_s20  ;;  %628 = vrot.lane.b32.xlu0 %v637_v4, %s679_s15 }
  0x1b   : > { %643 = vrot.lane.b32.xlu1 %v637_v4, %s681_s21  ;;  %633 = vrot.lane.b32.xlu0 %v637_v4, %s678_s14 }
  0x1f   : > { %274 = vrot.lane.b32.xlu1 %v677_v0, %s681_s21  ;;  %216 = vrot.lane.b32.xlu0 %v677_v0, %s680_s20 }
  0x23   : > { %314 = vrot.lane.b32.xlu1 %v172_v2, %s682_s22  ;;  %648 = vrot.lane.b32.xlu0 %v647_v5, %s682_s22 }
  0x27   : > { %658 = vrot.lane.b32.xlu1 %v647_v5, %s683_s23  ;;  %653 = vrot.lane.b32.xlu0 %v647_v5, %s684_s24 }
  0x2b   : > { %335 = vrot.lane.b32.xlu1 %v172_v2, %s683_s23  ;;  %350 = vrot.lane.b32.xlu0 %v172_v2, %s684_s24 }
  0x2f   : > { %663 = vrot.lane.b32.xlu0 %v647_v5, %s685_s25  ;;  %371 = vrot.lane.b32.xlu1 %v172_v2, %s685_s25 }
  0x33   : > { %409 = vperm.xlu1 %668, %v400_v6   ;;  %404 = vperm.xlu0 %667, %v399_v7  }
  0x37   : > { %414 = vperm.xlu1 %668, %v401_v9  }
  0x78   : > { %v242_v15 = vpop.permute.xlu0 %241  ;;  %v290_v16 = vpop.permute.xlu1 %289 }
  0x89   : > { %v639_v19 = vpop.permute.xlu1 %638  ;;  %v629_v20 = vpop.permute.xlu0 %628 }
  0x8a   : > { %v641_v22 = vunpack.i.h.bf16 %v639_v19  ;;  %v640_v23 = vunpack.i.l.bf16 %v639_v19  ;;  %v631_v24 = vunpack.i.h.bf16 %v629_v20  ;;  %v630_v25 = vunpack.i.l.bf16 %v629_v20 }
  0x8c   : > { %v296_v26 = vsel %vm295_vm0, %v290_v16, %v630_v25  ;;  %v297_v27 = vsel %vm295_vm0, %v630_v25, %v631_v24  ;;  %v224_v29 = vsel %vm222_vm3, %v640_v23, %v641_v22 }
  0x8d   : > { %v301_v30 = vsel %vm206_vm1, %v297_v27, 0.0  ;;  %v644_v31 = vpop.permute.xlu1 %643  ;;  %v634_v32 = vpop.permute.xlu0 %633  ;;  %v228_v33 = vsel %vm206_vm1, %v224_v29, 0.0  ;;  %v300_v34 = vsel %vm205_vm2, %v296_v26, 0.0 }
  0x8e   : > { %v305_v35 = vrot.slane %v301_v30, 4  ;;  %v646_v36 = vunpack.i.h.bf16 %v644_v31  ;;  %v645_v37 = vunpack.i.l.bf16 %v644_v31  ;;  %v636_v38 = vunpack.i.h.bf16 %v634_v32  ;;  %230 = vst [vmem:[#allocation2 + $0x8] sm:$0xf] %v228_v33 }
  0x8f   : > { %v635_v39 = vunpack.i.l.bf16 %v634_v32  ;;  %v304_v40 = vrot.slane %v300_v34, 4 }
  0x90   : > { %309 = vst [vmem:[#allocation2 + $0x18] sm:$0xf0] %v305_v35  ;;  %v282_v41 = vsel %vm280_vm5, %v645_v37, %v646_v36 }
  0x91   : > { %v248_v42 = vsel %vm247_vm4, %v242_v15, %v635_v39  ;;  %v249_v43 = vsel %vm247_vm4, %v635_v39, %v636_v38  ;;  %v275_v44 = vpop.permute.xlu1 %274  ;;  %v286_v45 = vsel %vm267_vm6, %v282_v41, 0.0  ;;  %v217_v46 = vpop.permute.xlu0 %216  ;;  %308 = vst [vmem:[#allocation2 + $0x10] sm:$0xf0] %v304_v40  ;;  %v386_v39 = vld [vmem:[%s801_s1] sm:$0xff]  ;;  %v388_v40 = vld [vmem:[%s801_s1 + $0x10] sm:$0x3] }
  0x92   : > { %v256_v47 = vrot.slane %v248_v42, 4  ;;  %v257_v48 = vrot.slane %v249_v43, 4  ;;  %v281_v49 = vsel %vm280_vm5, %v275_v44, %v645_v37  ;;  %288 = vst [vmem:[#allocation2 + $0x18] sm:$0xf] %v286_v45  ;;  %v223_v50 = vsel %vm222_vm3, %v217_v46, %v640_v23 }
  0x93   : > { %v285_v51 = vsel %vm266_vm7, %v281_v49, 0.0  ;;  %v227_v52 = vsel %vm205_vm2, %v223_v50, 0.0 }
  0x94   : > { %260 = vst [vmem:[#allocation2] sm:$0xf0] %v256_v47  ;;  %261 = vst [vmem:[#allocation2 + $0x8] sm:$0xf0] %v257_v48 }
  0x95   : > { %287 = vst [vmem:[#allocation2 + $0x10] sm:$0xf] %v285_v51  ;;  %229 = vst [vmem:[#allocation2] sm:$0xf] %v227_v52  ;;  %v315_v53 = vpop.permute.xlu1 %314  ;;  %v649_v54 = vpop.permute.xlu0 %648 }
  0x96   : > { %v651_v55 = vunpack.i.h.bf16 %v649_v54  ;;  %v650_v56 = vunpack.i.l.bf16 %v649_v54 }
  0x98   : > { %v321_v57 = vsel %vm320_vm8, %v315_v53, %v650_v56  ;;  %v322_v58 = vsel %vm320_vm8, %v650_v56, %v651_v55 }
  0x99   : > { %v325_v59 = vsel %vm266_vm7, %v321_v57, 0.0  ;;  %v326_v60 = vsel %vm267_vm6, %v322_v58, 0.0  ;;  %v659_v61 = vpop.permute.xlu1 %658  ;;  %v654_v62 = vpop.permute.xlu0 %653  ;;  %v392_v63 = vld [vmem:[#allocation2 + $0x18] sm:$0xff] }
  0x9a   : > { %v329_v1 = vrot.slane %v325_v59, 4  ;;  %v330_v2 = vrot.slane %v326_v60, 4  ;;  %v661_v3 = vunpack.i.h.bf16 %v659_v61  ;;  %v660_v4 = vunpack.i.l.bf16 %v659_v61 }
  0x9b   : > { %v656_v5 = vunpack.i.h.bf16 %v654_v62  ;;  %v655_v6 = vunpack.i.l.bf16 %v654_v62  ;;  %v390_v7 = vld [vmem:[#allocation2 + $0x8] sm:$0xff] }
  0x9c   : > { %v389_v8 = vld [vmem:[#allocation2] sm:$0xff]  ;;  %v391_v9 = vld [vmem:[#allocation2 + $0x10] sm:$0xff]  ;;  %333 = vst [vmem:[#allocation2 + $0x20] sm:$0xf0] %v329_v1  ;;  %334 = vst [vmem:[#allocation2 + $0x28] sm:$0xf0] %v330_v2  ;;  %v343_v10 = vsel %vm341_vm9, %v660_v4, %v661_v3  ;;  %v594_v11 = vpack.c.bf16 %v392_v63, %v390_v7 }
  0x9d   : > { %v596_v12 = vpack.c.bf16 %v391_v9, %v389_v8  ;;  %v336_v13 = vpop.permute.xlu1 %335  ;;  %v347_v14 = vsel %vm206_vm1, %v343_v10, 0.0  ;;  %v351_v15 = vpop.permute.xlu0 %350  ;;  %v358_v16 = vsel %vm356_vm10, %v655_v6, %v656_v5 }
  0x9e   : > { %v342_v19 = vsel %vm341_vm9, %v336_v13, %v660_v4  ;;  %349 = vst [vmem:[#allocation2 + $0x38] sm:$0xf] %v347_v14  ;;  %v357_v20 = vsel %vm356_vm10, %v351_v15, %v655_v6  ;;  %v366_v22 = vrot.slane %v358_v16, 4  ;;  %595 = vmatprep.subr.bf16.mxu0 %v594_v11  ;;  %602 = vmatprep.subr.bf16.mxu1 %v594_v11 }
  0x9f   : > { %v346_v23 = vsel %vm205_vm2, %v342_v19, 0.0  ;;  %v365_v24 = vrot.slane %v357_v20, 4  ;;  %597 = vmatpush1.bf16.msra.mxu0 %v596_v12  ;;  %605 = vmatpush1.bf16.msra.mxu1 %v596_v12 }
  0xa0   : > { %348 = vst [vmem:[#allocation2 + $0x30] sm:$0xf] %v346_v23  ;;  %370 = vst [vmem:[#allocation2 + $0x38] sm:$0xf0] %v366_v22 }
  0xa1   : > { %369 = vst [vmem:[#allocation2 + $0x30] sm:$0xf0] %v365_v24  ;;  %v664_v17 = vpop.permute.xlu0 %663  ;;  %v372_v25 = vpop.permute.xlu1 %371 }
  0xa2   : > { %v666_v26 = vunpack.i.h.bf16 %v664_v17  ;;  %v665_v27 = vunpack.i.l.bf16 %v664_v17 }
  0xa3   : > { %v394_v32 = vld [vmem:[#allocation2 + $0x28] sm:$0xff]  ;;  %v393_v35 = vld [vmem:[#allocation2 + $0x20] sm:$0xff] }
  0xa4   : > { %v378_v29 = vsel %vm377_vm11, %v372_v25, %v665_v27  ;;  %v379_v30 = vsel %vm377_vm11, %v665_v27, %v666_v26 }
  0xa5   : > { %v382_v31 = vsel %vm266_vm7, %v378_v29, 0.0  ;;  %v383_v18 = vsel %vm267_vm6, %v379_v30, 0.0 }
  0xa6   : > { %384 = vst [vmem:[#allocation2 + $0x40] sm:$0xf] %v382_v31  ;;  %385 = vst [vmem:[#allocation2 + $0x48] sm:$0xf] %v383_v18 }
  0xa7   : > { %v396_v33 = vld [vmem:[#allocation2 + $0x38] sm:$0xff] }
  0xa8   : > { %v598_v34 = vpack.c.bf16 %v396_v33, %v394_v32  ;;  %v395_v36 = vld [vmem:[#allocation2 + $0x30] sm:$0xff] }
  0xa9   : > { %v600_v37 = vpack.c.bf16 %v395_v36, %v393_v35 }
  0xaa   : > { %599 = vmatprep.subr.bf16.mxu0 %v598_v34  ;;  %603 = vmatprep.subr.bf16.mxu1 %v598_v34 }
  0xab   : > { %601 = vmatpush1.bf16.msra.mxu0 %v600_v37  ;;  %606 = vmatpush1.bf16.msra.mxu1 %v600_v37 }
  0xad   : > { %v398_v21 = vld [vmem:[#allocation2 + $0x48] sm:$0xf]  ;;  %v397_v38 = vld [vmem:[#allocation2 + $0x40] sm:$0xf] }
  0xae   : > { %586 = vmatprep.subr.msk.mxu0 %vm427_vm12, %v398_v21  ;;  %604 = vmatprep.subr.msk.mxu1 %vm427_vm12, %v398_v21 }
  0xaf   : > { %587 = vmatpush1.msk.msra.mxu0 %vm427_vm12, %v397_v38  ;;  %607 = vmatpush1.msk.msra.mxu1 %vm427_vm12, %v397_v38 }
  0xb0   : > { %589 = vmatmul.mubr.msk.f32.vlgmr.msra.gmra.mrb[0].mxu1 %vm417_vm13, %v387_v28  ;;  %588 = vmatmul.mubr.msk.f32.vlgmr.msra.gmra.mrb[0].mxu0 %vm417_vm13, %v386_v39 }
  0xb1   : > { %510 = vmatprep.mubr.f32.mxu1 %v677_v0 }
  0xb2   : > { %v410_v41 = vpop.permute.xlu1 %409  ;;  %v405_v42 = vpop.permute.xlu0 %404 }
  0xb4   : > { %590 = vmatmul.mubr.msk.f32.gmra.mrb[2].mxu1 %vm417_vm13, %v388_v40 }
  0xb6   : > { %v415_v50 = vpop.permute.xlu1 %414 }
 0x183   : > { %v506_v43 = vpop.f32.mrb[0].mxu1  ;;  %v500_v44 = vpop.f32.mrb[0].mxu0 }
 0x184   : > { %v507_v45 = vadd.f32 %v506_v43, %v410_v41  ;;  %v508_v46 = vpop.f32.mrb[1].mxu1  ;;  %v501_v47 = vadd.f32 %v500_v44, %v405_v42  ;;  %v502_v48 = vpop.f32.mrb[1].mxu0 }
 0x185   : > { %v509_v49 = vadd.f32 %v508_v46, %v410_v41  ;;  %v503_v0 = vadd.f32 %v502_v48, %v405_v42 }
 0x186   : > { %519 = vst [vmem:[%s170_s16 + $0x10] sm:$0xff] %v507_v45  ;;  %517 = vst [vmem:[%s170_s16] sm:$0xff] %v501_v47 }
 0x187   : > { %520 = vst [vmem:[%s170_s16 + $0x18] sm:$0xff] %v509_v49  ;;  %518 = vst [vmem:[%s170_s16 + $0x8] sm:$0xff] %v503_v0  ;;  %v512_v51 = vpop.f32.mrb[2].mxu1 }
 0x188   : > { %v513_v52 = vadd.f32 %v512_v51, %v415_v50  ;;  %v514_v53 = vpop.f32.mrb[3].mxu1 }
 0x189   : > { %v515_v54 = vadd.f32 %v514_v53, %v415_v50 }
 0x18a   : > { %521 = vst [vmem:[%s170_s16 + $0x20] sm:$0x3] %v513_v52 }
 0x18b   : > { %522 = vst [vmem:[%s170_s16 + $0x28] sm:$0x3] %v515_v54 }
 0x18c PF: > { %s13_s12 = sadd.s32 1, %s675_s12  }
 0x18d   : > { %p10_p4 = scmp.ge.s32.totalorder %s13_s12, 4  }
 0x18f   :  { %12 = sbr.rel (!%p10_p4) target bundleno = 1 (0x1), region = 62 }

// kernel: attention_forward.11
= control target key start
LH: loop header
LB: loop body
LE: loop exit
PB: predicated region body
PF: predicated region fallthrough
CT: control target
= control target key end

     0   :  { %s828_s24 = smov 0   ;;  %s830_s25 = smov 0   ;;  %s889_s0 = inlined_call_operand.vmem [shape: bf16[2,4,256], index: 0, kind: input, shape index: {}]   ;;  %s890_s1 = inlined_call_operand.vmem [shape: f32[4,4], index: 1, kind: input, shape index: {}]   ;;  %s891_s2 = inlined_call_operand.vmem [shape: f32[4,1], index: 2, kind: input, shape index: {}]   ;;  %s892_s3 = inlined_call_operand.vmem [shape: bf16[2,4,256], index: 3, kind: input, shape index: {}]   ;;  %s893_s4 = inlined_call_operand.vmem [shape: f32[4,4], index: 4, kind: input, shape index: {}]   ;;  %s894_s5 = inlined_call_operand.vmem [shape: f32[4,1], index: 5, kind: input, shape index: {}]   ;;  %s895_s6 = inlined_call_operand.vmem [shape: f32[2,4,256], index: 6, kind: input, shape index: {}]   ;;  %s896_s7 = inlined_call_operand.vmem [shape: f32[2,4,256], index: 7, kind: output, shape index: {}]  }
   0x1   :  { %s832_s26 = smov 0  }
   0x2 LB: > { %s29_s27 = sadd.s32 1, %s780_s25  ;;  %p713_p0 = scmp.ge.s32.totalorder %s784_s26, 1  ;;  %s784_s26 = sphi %s832_s26, %s17_s26   ;;  %s780_s25 = sphi %s830_s25, %s898_s25   ;;  %s776_s24 = sphi %s828_s24, %s897_s24  }
   0x3   : > { %p31_p1 = scmp.ge.s32.totalorder %s29_s27, 2  ;;  %p292_p2 = scmp.lt.s32.totalorder %s784_s26, 3 }
   0x5   : > { %s900_s27 = smov (%p31_p1, %s29_s27), 0  ;;  %p293_p3 = pnand %p713_p0, %p292_p2 }
   0x6   : > { %p351_p4 = scmp.lt.s32.totalorder (!%p293_p3), %s776_s24, 1  ;;  %v786_v0 = vmov (!%p293_p3), 0.0   ;;  %v393_v1 = vld [vmem:[%s891_s2] sm:$0xf] (!%p293_p3)  ;;  %v787_v2 = vmov (!%p293_p3), 0   ;;  %vm405_vm0 = vcmask (!%p293_p3), 1043456  }
   0x7   : > { %296 = sbr.rel (%p293_p3) target bundleno = 467 (0x1d3), region = 48  ;;  %474 = vmatprep.mubr.f32.mxu0 (!%p293_p3), %v786_v0  ;;  %568 = vmatprep.mubr.f32.mxu1 (!%p293_p3), %v786_v0  ;;  %v489_v3 = vld [vmem:[%s894_s5] sm:$0xf] (!%p293_p3)  ;;  %vm401_vm1 = vcmask (!%p293_p3), 31744  }
   0x8   : > { %760 = vset.pattern.permute.xlu0 (!%p293_p3), %v787_v2  ;;  %v390_v7 = vld [vmem:[%s890_s1] sm:$0xf] (!%p293_p3) }
   0x9   : > { %396 = vperm.xlu0 (!%p293_p3), %760, %v393_v1   ;;  %v488_v18 = vld [vmem:[%s893_s4] sm:$0xf] (!%p293_p3) }
   0xd   : > { %492 = vperm.xlu0 (!%p293_p3), %760, %v489_v3  }
   0xe   : > { %s902_s24 = smov (!%p351_p4, %s776_s24), 1 }
   0xf   : > { %s730_s30 = sshll.u32 %s902_s24, 2  ;;  %s732_s20 = sshll.u32 %s902_s24, 3 }
  0x10   : > { %s358_s12 = scalar_lea.vmem %s889_s0, %s730_s30  ;;  %s368_s17 = scalar_lea.vmem %s892_s3, %s730_s30 }
  0x11   : > { %v391_v4 = vld [vmem:[%s358_s12] sm:$0xf]  ;;  %s378_s23 = scalar_lea.vmem %s895_s6, %s732_s20  ;;  %s388_s30 = scalar_lea.vmem %s896_s7, %s732_s20 }
  0x12   : > { %v392_v5 = vunpack.c.l.bf16 %v391_v4  ;;  %v481_v8 = vld [vmem:[%s368_s17] sm:$0xf] }
  0x13   : > { %v482_v14 = vunpack.c.l.bf16 %v481_v8  ;;  %v575_v19 = vld [vmem:[%s378_s23] sm:$0xff] }
  0x14   : > { %v400_v6 = vcombine.high %v392_v5, %v392_v5  ;;  %v577_v22 = vcombine.high %v575_v19, %v575_v19 }
  0x16   : > { %722 = vmatprep.subr.msk.mxu0 %vm405_vm0, %v400_v6 }
  0x17   : > { %723 = vmatpush1.msk.msra.mxu0 %vm405_vm0, %v392_v5 }
  0x18   : > { %724 = vmatmul.mubr.msk.f32.vlgmr.msra.gmra.mrb[0].mxu0 %vm401_vm1, %v390_v7 }
  0x88   : > { %v397_v9 = vpop.permute.xlu0 %396 }
  0x8c   : > { %v493_v20 = vpop.permute.xlu0 %492 }
  0xeb   : > { %v476_v10 = vpop.f32.mrb[0].mxu0 }
  0xec   : > { %v477_v11 = vadd.f32 %v476_v10, %v397_v9  ;;  %v478_v12 = vpop.f32.mrb[1].mxu0 }
  0xed   : > { %v479_v13 = vadd.f32 %v478_v12, %v397_v9 }
  0xef   : > { %v485_v15 = vcombine.low %v477_v11, %v479_v13 }
  0xf1   : > { %v487_v16 = vmul.f32 %v485_v15, %v482_v14 }
  0xf3   : > { %v496_v17 = vcombine.high %v487_v16, %v487_v16 }
  0xf5   : > { %725 = vmatprep.subr.msk.mxu1 %vm405_vm0, %v496_v17 }
  0xf6   : > { %726 = vmatpush1.msk.msra.mxu1 %vm405_vm0, %v487_v16 }
  0xf7   : > { %727 = vmatmul.mubr.msk.f32.vlgmr.msra.gmra.mrb[0].mxu1 %vm401_vm1, %v488_v18 }
 0x1ca   : > { %v570_v21 = vpop.f32.mrb[0].mxu1 }
 0x1cb   : > { %v571_v23 = vadd.f32 %v570_v21, %v493_v20  ;;  %v572_v24 = vpop.f32.mrb[1].mxu1 }
 0x1cc   : > { %v573_v25 = vadd.f32 %v572_v24, %v493_v20 }
 0x1cd   : > { %v579_v26 = vadd.f32 %v575_v19, %v571_v23 }
 0x1ce   : > { %v580_v27 = vadd.f32 %v577_v22, %v573_v25 }
 0x1d0   : > { %v583_v28 = vcombine.low %v579_v26, %v580_v27 }
 0x1d2   : > { %585 = vst [vmem:[%s388_s30] sm:$0xff] %v583_v28 }
 0x1d3 PF: > { %s17_s26 = sadd.s32 1, %s784_s26   ;;  %s897_s24 = smov %s780_s25 }
 0x1d4   : > { %p14_p5 = scmp.ge.s32.totalorder %s17_s26, 4   ;;  %s898_s25 = smov %s900_s27 }
 0x1d6   :  { %16 = sbr.rel (!%p14_p5) target bundleno = 2 (0x2), region = 84 }

</bundles_post_ra>
